<compile_context>
chip_gen: v7x
topology: tpu7x:2x2x1
jax: 0.10.0
libtpu: 0.0.40
codegen_flags: <defaults>
</compile_context>

<pallas_src>
import functools
import numpy as np
import jax
import jax.numpy as jnp
from jax.experimental import pallas as pl
from jax.experimental.pallas import tpu as pltpu

# Module instance: SqueezeExcitation(input_c=64, expand_c=256, squeeze_factor=4)
INPUT_C = 64
EXPAND_C = 256
SQUEEZE_C = INPUT_C // 4          # 16
N, H, W = 2, 16, 16               # small deterministic test shape (H*W = 256, lane-dense)


def _sigmoid(v):
    return 1.0 / (1.0 + jnp.exp(-v))


# --------------------------------------------------------------------------- kernel
def se_fused_kernel(x_ref, w1_ref, b1_ref, w2t_ref, b2_ref, o_ref, *, inv_hw):
    """One sample per grid step: pool -> fc1 -> SiLU -> fc2 -> sigmoid -> rescale (all f32)."""
    x = x_ref[...]                                                   # (C, HW) f32
    # Global average pool: cross-lane reduce; C stays on sublanes.
    pooled = jnp.sum(x, axis=1, keepdims=True) * inv_hw              # (C, 1)
    # fc1: contract over C (sublane axis) -> (1, Csq).  Tiny: VPU mul + sublane reduce.
    h = jnp.sum(w1_ref[...] * pooled, axis=0, keepdims=True) + b1_ref[...]
    h = h * _sigmoid(h)                                              # SiLU
    # fc2: contract over Csq (lane axis) -> (C, 1), already column-shaped for the rescale.
    s = jnp.sum(w2t_ref[...] * h, axis=1, keepdims=True) + b2_ref[...]
    s = _sigmoid(s)                                                  # (C, 1) gate
    o_ref[...] = x * s                                               # lane-broadcast rescale


# --------------------------------------------------------------------------- wrapper
@jax.jit
def squeeze_excitation_forward(x_nchw, params):
    n, c, h, w = x_nchw.shape
    hw = h * w
    x = x_nchw.reshape(n, c, hw).astype(jnp.float32)        # free, contiguous reshape
    csq = params["w1"].shape[1]

    # Per-sample slab (in + out, double-buffered) must fit scoped VMEM; for this module's
    # shapes it is ~1 MiB total.  Re-tile the H*W axis into bands if ever reused at
    # feature-map sizes where a sample slab exceeds a few MiB (v7x has 64 MiB physical VMEM).
    assert 4 * (c * hw * 4) <= 32 * 1024 * 1024

    cost = pl.CostEstimate(
        flops=n * (2 * c * hw + 4 * c * csq),
        transcendentals=n * (c + 2 * csq),
        bytes_accessed=2 * x.size * 4 + 2 * c * csq * 4 + (c + csq) * 4)

    kernel = functools.partial(se_fused_kernel, inv_hw=1.0 / float(hw))
    out = pl.pallas_call(
        kernel,
        out_shape=jax.ShapeDtypeStruct((n, c, hw), jnp.float32),
        grid=(n,),
        in_specs=[
            pl.BlockSpec((None, c, hw), lambda i: (i, 0, 0)),   # one (C, HW) sample slab
            pl.BlockSpec((c, csq), lambda i: (0, 0)),           # fc1 weight   (C, Csq)
            pl.BlockSpec((1, csq), lambda i: (0, 0)),           # fc1 bias     (1, Csq)
            pl.BlockSpec((c, csq), lambda i: (0, 0)),           # fc2 weight^T (C, Csq)
            pl.BlockSpec((c, 1), lambda i: (0, 0)),             # fc2 bias     (C, 1)
        ],
        out_specs=pl.BlockSpec((None, c, hw), lambda i: (i, 0, 0)),
        compiler_params=pltpu.CompilerParams(
            dimension_semantics=("parallel",),                  # one sample per v7x TC
            vmem_limit_bytes=32 * 1024 * 1024),
        cost_estimate=cost,
    )(x, params["w1"], params["b1"], params["w2t"], params["b2"])

    return out.reshape(n, c, h, w)


# --------------------------------------------------------------------------- params / ref
def init_params(key):
    k1, k2, k3, k4 = jax.random.split(key, 4)
    # fc1/fc2 are 1x1 convs on a (N, C, 1, 1) tensor == dense layers.  Stored so that both
    # contractions happen in the kernel's natural layout:
    #   w1  : (expand_c, squeeze_c)   (input-major, used as  pooled^T-contracted over sublanes)
    #   w2t : (expand_c, squeeze_c)   (fc2 weight transposed, contracted over lanes)
    w1 = jax.random.normal(k1, (EXPAND_C, SQUEEZE_C), jnp.float32) / np.sqrt(EXPAND_C)
    b1 = 0.1 * jax.random.normal(k2, (1, SQUEEZE_C), jnp.float32)
    w2t = jax.random.normal(k3, (EXPAND_C, SQUEEZE_C), jnp.float32) / np.sqrt(SQUEEZE_C)
    b2 = 0.1 * jax.random.normal(k4, (EXPAND_C, 1), jnp.float32)
    return dict(w1=w1, b1=b1, w2t=w2t, b2=b2)


def reference_forward(x_nchw, p):
    """Pure-JAX (f32) reference mirroring the PyTorch forward."""
    x = x_nchw.astype(jnp.float32)
    pooled = jnp.mean(x, axis=(2, 3))                               # adaptive_avg_pool2d -> (N, C)
    h = pooled @ p["w1"] + p["b1"]                                  # fc1
    h = h * jax.nn.sigmoid(h)                                       # SiLU
    s = jax.nn.sigmoid(h @ p["w2t"].T + p["b2"].reshape(1, -1))     # fc2 + Sigmoid
    return x * s[:, :, None, None]                                  # channel rescale


if __name__ == "__main__":
    key = jax.random.PRNGKey(0)
    kx, kc, kp = jax.random.split(key, 3)
    # Per-channel offsets make the pooled means O(1) so the SE gate is exercised non-trivially.
    x = (jax.random.normal(kx, (N, EXPAND_C, H, W), jnp.float32)
         + jax.random.normal(kc, (1, EXPAND_C, 1, 1), jnp.float32))
    params = init_params(kp)

    out = jax.block_until_ready(squeeze_excitation_forward(x, params))
    assert out.shape == (N, EXPAND_C, H, W)

    ref = jax.block_until_ready(reference_forward(x, params))
    np.testing.assert_allclose(np.asarray(out), np.asarray(ref), rtol=1e-4, atol=1e-4)
    print("KERNEL_OK")
</pallas_src>

<mosaic_0001>
module attributes {stable_mosaic.version = 11 : i64} {
  func.func @se_fused_kernel(%arg0: i32, %arg1: memref<1x256x256xf32, #tpu.memory_space<vmem>>, %arg2: memref<256x16xf32, #tpu.memory_space<vmem>>, %arg3: memref<1x16xf32, #tpu.memory_space<vmem>>, %arg4: memref<256x16xf32, #tpu.memory_space<vmem>>, %arg5: memref<256x1xf32, #tpu.memory_space<vmem>>, %arg6: memref<1x256x256xf32, #tpu.memory_space<vmem>>) attributes {dimension_semantics = [#tpu.dimension_semantics<parallel>], iteration_bounds = array<i64: 2>, scalar_prefetch = 0 : i64, scratch_operands = 0 : i64, tpu.core_type = #tpu.core_type<tc>, window_params = [{transform_indices = @transform_0, window_bounds = array<i64: 1, 256, 256>}, {pipeline_mode = #tpu.pipeline_mode<synchronous>, transform_indices = @transform_1, window_bounds = array<i64: 256, 16>}, {pipeline_mode = #tpu.pipeline_mode<synchronous>, transform_indices = @transform_2, window_bounds = array<i64: 1, 16>}, {pipeline_mode = #tpu.pipeline_mode<synchronous>, transform_indices = @transform_3, window_bounds = array<i64: 256, 16>}, {pipeline_mode = #tpu.pipeline_mode<synchronous>, transform_indices = @transform_4, window_bounds = array<i64: 256, 1>}, {transform_indices = @transform_5, window_bounds = array<i64: 1, 256, 256>}]} {
    %c0 = arith.constant 0 : index
    %c0_0 = arith.constant 0 : index
    %c0_1 = arith.constant 0 : index
    %0 = vector.load %arg1[%c0, %c0_0, %c0_1] : memref<1x256x256xf32, #tpu.memory_space<vmem>>, vector<1x256x256xf32>
    %1 = vector.shape_cast %0 : vector<1x256x256xf32> to vector<256x256xf32>
    %cst = arith.constant dense<0.000000e+00> : vector<256xf32>
    %2 = vector.multi_reduction <add>, %1, %cst [1] : vector<256x256xf32> to vector<256xf32>
    %3 = vector.shape_cast %2 : vector<256xf32> to vector<256x1xf32>
    %cst_2 = arith.constant 3.906250e-03 : f32
    %4 = vector.broadcast %cst_2 : f32 to vector<256x1xf32>
    %5 = arith.mulf %3, %4 : vector<256x1xf32>
    %c0_3 = arith.constant 0 : index
    %c0_4 = arith.constant 0 : index
    %6 = vector.load %arg2[%c0_3, %c0_4] : memref<256x16xf32, #tpu.memory_space<vmem>>, vector<256x16xf32>
    %7 = vector.broadcast %5 : vector<256x1xf32> to vector<256x16xf32>
    %8 = arith.mulf %6, %7 : vector<256x16xf32>
    %cst_5 = arith.constant dense<0.000000e+00> : vector<16xf32>
    %9 = vector.multi_reduction <add>, %8, %cst_5 [0] : vector<256x16xf32> to vector<16xf32>
    %10 = vector.shape_cast %9 : vector<16xf32> to vector<1x16xf32>
    %c0_6 = arith.constant 0 : index
    %c0_7 = arith.constant 0 : index
    %11 = vector.load %arg3[%c0_6, %c0_7] : memref<1x16xf32, #tpu.memory_space<vmem>>, vector<1x16xf32>
    %12 = arith.addf %10, %11 : vector<1x16xf32>
    %cst_8 = arith.constant 0.000000e+00 : f32
    %13 = vector.broadcast %cst_8 : f32 to vector<1x16xf32>
    %14 = arith.subf %13, %12 : vector<1x16xf32>
    %15 = math.exp %14 : vector<1x16xf32>
    %cst_9 = arith.constant 1.000000e+00 : f32
    %16 = vector.broadcast %cst_9 : f32 to vector<1x16xf32>
    %17 = arith.addf %16, %15 : vector<1x16xf32>
    %cst_10 = arith.constant 1.000000e+00 : f32
    %18 = vector.broadcast %cst_10 : f32 to vector<1x16xf32>
    %19 = arith.divf %18, %17 : vector<1x16xf32>
    %20 = arith.mulf %12, %19 : vector<1x16xf32>
    %c0_11 = arith.constant 0 : index
    %c0_12 = arith.constant 0 : index
    %21 = vector.load %arg4[%c0_11, %c0_12] : memref<256x16xf32, #tpu.memory_space<vmem>>, vector<256x16xf32>
    %22 = vector.broadcast %20 : vector<1x16xf32> to vector<256x16xf32>
    %23 = arith.mulf %21, %22 : vector<256x16xf32>
    %cst_13 = arith.constant dense<0.000000e+00> : vector<256xf32>
    %24 = vector.multi_reduction <add>, %23, %cst_13 [1] : vector<256x16xf32> to vector<256xf32>
    %25 = vector.shape_cast %24 : vector<256xf32> to vector<256x1xf32>
    %c0_14 = arith.constant 0 : index
    %c0_15 = arith.constant 0 : index
    %26 = vector.load %arg5[%c0_14, %c0_15] : memref<256x1xf32, #tpu.memory_space<vmem>>, vector<256x1xf32>
    %27 = arith.addf %25, %26 : vector<256x1xf32>
    %cst_16 = arith.constant 0.000000e+00 : f32
    %28 = vector.broadcast %cst_16 : f32 to vector<256x1xf32>
    %29 = arith.subf %28, %27 : vector<256x1xf32>
    %30 = math.exp %29 : vector<256x1xf32>
    %cst_17 = arith.constant 1.000000e+00 : f32
    %31 = vector.broadcast %cst_17 : f32 to vector<256x1xf32>
    %32 = arith.addf %31, %30 : vector<256x1xf32>
    %cst_18 = arith.constant 1.000000e+00 : f32
    %33 = vector.broadcast %cst_18 : f32 to vector<256x1xf32>
    %34 = arith.divf %33, %32 : vector<256x1xf32>
    %35 = vector.broadcast %34 : vector<256x1xf32> to vector<256x256xf32>
    %36 = arith.mulf %1, %35 : vector<256x256xf32>
    %c0_19 = arith.constant 0 : index
    %c0_20 = arith.constant 0 : index
    %c0_21 = arith.constant 0 : index
    %37 = vector.load %arg6[%c0_19, %c0_20, %c0_21] : memref<1x256x256xf32, #tpu.memory_space<vmem>>, vector<1x256x256xf32>
    %38 = vector.shape_cast %37 : vector<1x256x256xf32> to vector<256x256xf32>
    %39 = vector.shape_cast %36 : vector<256x256xf32> to vector<1x256x256xf32>
    tpu.vector_store %arg6[%c0_19, %c0_20, %c0_21], %39 {strides = array<i32>} : memref<1x256x256xf32, #tpu.memory_space<vmem>>, vector<1x256x256xf32>,
    return
  }
  func.func @transform_0(%arg0: i32) -> (i32, i32, i32) {
    %c0_i32 = arith.constant 0 : i32
    %c0_i32_0 = arith.constant 0 : i32
    %c0_i32_1 = arith.constant 0 : i32
    return %arg0, %c0_i32, %c0_i32_0 : i32, i32, i32
  }
  func.func @transform_1(%arg0: i32) -> (i32, i32) {
    %c0_i32 = arith.constant 0 : i32
    %c0_i32_0 = arith.constant 0 : i32
    %c0_i32_1 = arith.constant 0 : i32
    return %c0_i32, %c0_i32_0 : i32, i32
  }
  func.func @transform_2(%arg0: i32) -> (i32, i32) {
    %c0_i32 = arith.constant 0 : i32
    %c0_i32_0 = arith.constant 0 : i32
    %c0_i32_1 = arith.constant 0 : i32
    return %c0_i32, %c0_i32_0 : i32, i32
  }
  func.func @transform_3(%arg0: i32) -> (i32, i32) {
    %c0_i32 = arith.constant 0 : i32
    %c0_i32_0 = arith.constant 0 : i32
    %c0_i32_1 = arith.constant 0 : i32
    return %c0_i32, %c0_i32_0 : i32, i32
  }
  func.func @transform_4(%arg0: i32) -> (i32, i32) {
    %c0_i32 = arith.constant 0 : i32
    %c0_i32_0 = arith.constant 0 : i32
    %c0_i32_1 = arith.constant 0 : i32
    return %c0_i32, %c0_i32_0 : i32, i32
  }
  func.func @transform_5(%arg0: i32) -> (i32, i32, i32) {
    %c0_i32 = arith.constant 0 : i32
    %c0_i32_0 = arith.constant 0 : i32
    %c0_i32_1 = arith.constant 0 : i32
    return %arg0, %c0_i32, %c0_i32_0 : i32, i32, i32
  }
}

</mosaic_0001>

<bundles_post_ra>
// kernel: squeeze_excitation_forward.1
= control target key start
LH: loop header
LB: loop body
LE: loop exit
PB: predicated region body
PF: predicated region fallthrough
CT: control target
= control target key end

     0   :  { %s1582_s18 = smov 0   ;;  %s2191_s0 = inlined_call_operand.vmem [shape: f32[2,256,256], index: 0, kind: input, shape index: {}]   ;;  %s2192_s1 = inlined_call_operand.vmem [shape: f32[256,16], index: 1, kind: input, shape index: {}]   ;;  %s2193_s2 = inlined_call_operand.vmem [shape: f32[1,16], index: 2, kind: input, shape index: {}]   ;;  %s2194_s3 = inlined_call_operand.vmem [shape: f32[256,16], index: 3, kind: input, shape index: {}]   ;;  %s2195_s4 = inlined_call_operand.vmem [shape: f32[256,1], index: 4, kind: input, shape index: {}]   ;;  %s2196_s5 = inlined_call_operand.vmem [shape: f32[2,256,256], index: 5, kind: output, shape index: {}]  }
   0x1 LB: > { %s1323_s19 = sadd.s32 4294967295, %s1549_s18   ;;  %p1327_p0 = scmp.ge.s32.totalorder %s1549_s18, 1  ;;  %s1549_s18 = sphi %s1582_s18, %s15_s18  }
   0x2   : > { %p187_p1 = scmp.lt.s32.totalorder %s1549_s18, 3 }
   0x4   : > { %p188_p2 = pnand %p1327_p0, %p187_p1 }
   0x5   : > { %p215_p3 = scmp.lt.s32.totalorder (!%p188_p2), %s1323_s19, 1  ;;  %vm481_vm0 = vcmask (!%p188_p2), 130048  }
   0x6   : > { %191 = sbr.rel (%p188_p2) target bundleno = 657 (0x291), region = 40 }
   0xd   : > { %s2198_s19 = smov (!%p215_p3, %s1323_s19), 1 }
   0xe   : > { %s1334_s20 = sshll.u32 %s2198_s19, 9 }
   0xf   : > { %s1598_s23 = scalar_lea.vmem %s2191_s0, %s1334_s20  ;;  %s2058_s6 = scalar_lea.vmem %s2196_s5, %s1334_s20 }
  0x10   : > { %v225_v0 = vld [vmem:[%s1598_s23] sm:$0xff]  ;;  %v226_v1 = vld [vmem:[%s1598_s23 + $0x8] sm:$0xff]  ;;  %v227_v5 = vld [vmem:[%s1598_s23 + $0x10] sm:$0xff] }
  0x11   : > { %v229_v2 = vld [vmem:[%s1598_s23 + $0x20] sm:$0xff]  ;;  %v289_v3 = vadd.f32 %v226_v1, %v225_v0  ;;  %v230_v4 = vld [vmem:[%s1598_s23 + $0x28] sm:$0xff]  ;;  %v228_v6 = vld [vmem:[%s1598_s23 + $0x18] sm:$0xff] }
  0x12   : > { %v295_v7 = vadd.f32 %v230_v4, %v229_v2  ;;  %v231_v8 = vld [vmem:[%s1598_s23 + $0x30] sm:$0xff]  ;;  %v232_v9 = vld [vmem:[%s1598_s23 + $0x38] sm:$0xff]  ;;  %v292_v10 = vadd.f32 %v228_v6, %v227_v5  ;;  %v233_v12 = vld [vmem:[%s1598_s23 + $0x40] sm:$0xff] }
  0x13   : > { %290 = vadd.xlane.f32.xlu0 %v289_v3  ;;  %v298_v11 = vadd.f32 %v232_v9, %v231_v8  ;;  %v234_v13 = vld [vmem:[%s1598_s23 + $0x48] sm:$0xff]  ;;  %v235_v14 = vld [vmem:[%s1598_s23 + $0x50] sm:$0xff]  ;;  %v236_v15 = vld [vmem:[%s1598_s23 + $0x58] sm:$0xff] }
  0x14   : > { %296 = vadd.xlane.f32.xlu1 %v295_v7  ;;  %v301_v16 = vadd.f32 %v234_v13, %v233_v12  ;;  %v304_v17 = vadd.f32 %v236_v15, %v235_v14  ;;  %v237_v18 = vld [vmem:[%s1598_s23 + $0x60] sm:$0xff]  ;;  %v238_v19 = vld [vmem:[%s1598_s23 + $0x68] sm:$0xff]  ;;  %v239_v20 = vld [vmem:[%s1598_s23 + $0x70] sm:$0xff] }
  0x15   : > { %v240_v21 = vld [vmem:[%s1598_s23 + $0x78] sm:$0xff]  ;;  %v307_v22 = vadd.f32 %v238_v19, %v237_v18  ;;  %v241_v24 = vld [vmem:[%s1598_s23 + $0x80] sm:$0xff]  ;;  %v242_v25 = vld [vmem:[%s1598_s23 + $0x88] sm:$0xff] }
  0x16   : > { %v310_v23 = vadd.f32 %v240_v21, %v239_v20  ;;  %v243_v26 = vld [vmem:[%s1598_s23 + $0x90] sm:$0xff]  ;;  %v244_v27 = vld [vmem:[%s1598_s23 + $0x98] sm:$0xff]  ;;  %v313_v28 = vadd.f32 %v242_v25, %v241_v24  ;;  %v245_v30 = vld [vmem:[%s1598_s23 + $0xa0] sm:$0xff] }
  0x17   : > { %293 = vadd.xlane.f32.xlu0 %v292_v10  ;;  %v316_v29 = vadd.f32 %v244_v27, %v243_v26  ;;  %v246_v31 = vld [vmem:[%s1598_s23 + $0xa8] sm:$0xff]  ;;  %v247_v32 = vld [vmem:[%s1598_s23 + $0xb0] sm:$0xff]  ;;  %v248_v33 = vld [vmem:[%s1598_s23 + $0xb8] sm:$0xff] }
  0x18   : > { %299 = vadd.xlane.f32.xlu1 %v298_v11  ;;  %v319_v34 = vadd.f32 %v246_v31, %v245_v30  ;;  %v322_v35 = vadd.f32 %v248_v33, %v247_v32  ;;  %v249_v36 = vld [vmem:[%s1598_s23 + $0xc0] sm:$0xff]  ;;  %v250_v37 = vld [vmem:[%s1598_s23 + $0xc8] sm:$0xff]  ;;  %v251_v38 = vld [vmem:[%s1598_s23 + $0xd0] sm:$0xff] }
  0x19   : > { %v252_v39 = vld [vmem:[%s1598_s23 + $0xd8] sm:$0xff]  ;;  %v325_v40 = vadd.f32 %v250_v37, %v249_v36  ;;  %v253_v42 = vld [vmem:[%s1598_s23 + $0xe0] sm:$0xff]  ;;  %v254_v43 = vld [vmem:[%s1598_s23 + $0xe8] sm:$0xff] }
  0x1a   : > { %v328_v41 = vadd.f32 %v252_v39, %v251_v38  ;;  %v255_v44 = vld [vmem:[%s1598_s23 + $0xf0] sm:$0xff]  ;;  %v256_v45 = vld [vmem:[%s1598_s23 + $0xf8] sm:$0xff]  ;;  %v331_v46 = vadd.f32 %v254_v43, %v253_v42  ;;  %v257_v48 = vld [vmem:[%s1598_s23 + $0x100] sm:$0xff] }
  0x1b   : > { %302 = vadd.xlane.f32.xlu0 %v301_v16  ;;  %v334_v47 = vadd.f32 %v256_v45, %v255_v44  ;;  %v258_v49 = vld [vmem:[%s1598_s23 + $0x108] sm:$0xff]  ;;  %v259_v50 = vld [vmem:[%s1598_s23 + $0x110] sm:$0xff]  ;;  %v260_v51 = vld [vmem:[%s1598_s23 + $0x118] sm:$0xff] }
  0x1c   : > { %305 = vadd.xlane.f32.xlu1 %v304_v17  ;;  %v337_v52 = vadd.f32 %v258_v49, %v257_v48  ;;  %v340_v53 = vadd.f32 %v260_v51, %v259_v50  ;;  %v261_v54 = vld [vmem:[%s1598_s23 + $0x120] sm:$0xff]  ;;  %v262_v55 = vld [vmem:[%s1598_s23 + $0x128] sm:$0xff]  ;;  %v263_v56 = vld [vmem:[%s1598_s23 + $0x130] sm:$0xff] }
  0x1d   : > { %v264_v57 = vld [vmem:[%s1598_s23 + $0x138] sm:$0xff]  ;;  %v343_v58 = vadd.f32 %v262_v55, %v261_v54  ;;  %v265_v60 = vld [vmem:[%s1598_s23 + $0x140] sm:$0xff]  ;;  %v266_v61 = vld [vmem:[%s1598_s23 + $0x148] sm:$0xff] }
  0x1e   : > { %v346_v59 = vadd.f32 %v264_v57, %v263_v56  ;;  %v267_v62 = vld [vmem:[%s1598_s23 + $0x150] sm:$0xff]  ;;  %v268_v63 = vld [vmem:[%s1598_s23 + $0x158] sm:$0xff]  ;;  %v349_v0 = vadd.f32 %v266_v61, %v265_v60  ;;  %v269_v2 = vld [vmem:[%s1598_s23 + $0x160] sm:$0xff] }
  0x1f   : > { %308 = vadd.xlane.f32.xlu0 %v307_v22  ;;  %v352_v1 = vadd.f32 %v268_v63, %v267_v62  ;;  %v270_v3 = vld [vmem:[%s1598_s23 + $0x168] sm:$0xff]  ;;  %v271_v4 = vld [vmem:[%s1598_s23 + $0x170] sm:$0xff]  ;;  %v272_v5 = vld [vmem:[%s1598_s23 + $0x178] sm:$0xff] }
  0x20   : > { %311 = vadd.xlane.f32.xlu1 %v310_v23  ;;  %v355_v6 = vadd.f32 %v270_v3, %v269_v2  ;;  %v358_v7 = vadd.f32 %v272_v5, %v271_v4  ;;  %v273_v8 = vld [vmem:[%s1598_s23 + $0x180] sm:$0xff]  ;;  %v274_v9 = vld [vmem:[%s1598_s23 + $0x188] sm:$0xff]  ;;  %v275_v10 = vld [vmem:[%s1598_s23 + $0x190] sm:$0xff] }
  0x21   : > { %v276_v11 = vld [vmem:[%s1598_s23 + $0x198] sm:$0xff]  ;;  %v361_v12 = vadd.f32 %v274_v9, %v273_v8  ;;  %v277_v14 = vld [vmem:[%s1598_s23 + $0x1a0] sm:$0xff]  ;;  %v278_v15 = vld [vmem:[%s1598_s23 + $0x1a8] sm:$0xff] }
  0x22   : > { %v364_v13 = vadd.f32 %v276_v11, %v275_v10  ;;  %v279_v16 = vld [vmem:[%s1598_s23 + $0x1b0] sm:$0xff]  ;;  %v280_v17 = vld [vmem:[%s1598_s23 + $0x1b8] sm:$0xff]  ;;  %v367_v18 = vadd.f32 %v278_v15, %v277_v14  ;;  %v281_v20 = vld [vmem:[%s1598_s23 + $0x1c0] sm:$0xff] }
  0x23   : > { %314 = vadd.xlane.f32.xlu0 %v313_v28  ;;  %v370_v19 = vadd.f32 %v280_v17, %v279_v16  ;;  %v282_v21 = vld [vmem:[%s1598_s23 + $0x1c8] sm:$0xff]  ;;  %v283_v22 = vld [vmem:[%s1598_s23 + $0x1d0] sm:$0xff]  ;;  %v284_v23 = vld [vmem:[%s1598_s23 + $0x1d8] sm:$0xff] }
  0x24   : > { %317 = vadd.xlane.f32.xlu1 %v316_v29  ;;  %v373_v24 = vadd.f32 %v282_v21, %v281_v20  ;;  %v376_v25 = vadd.f32 %v284_v23, %v283_v22  ;;  %v285_v26 = vld [vmem:[%s1598_s23 + $0x1e0] sm:$0xff]  ;;  %v286_v27 = vld [vmem:[%s1598_s23 + $0x1e8] sm:$0xff]  ;;  %v287_v28 = vld [vmem:[%s1598_s23 + $0x1f0] sm:$0xff] }
  0x25   : > { %v288_v29 = vld [vmem:[%s1598_s23 + $0x1f8] sm:$0xff]  ;;  %v379_v30 = vadd.f32 %v286_v27, %v285_v26  ;;  %v419_v37 = vld [vmem:[%s2192_s1 + $0x10] sm:$0xff]  ;;  %v418_v38 = vld [vmem:[%s2192_s1 + $0x8] sm:$0xff] }
  0x26   : > { %v382_v31 = vadd.f32 %v288_v29, %v287_v28  ;;  %v420_v42 = vld [vmem:[%s2192_s1 + $0x18] sm:$0xff]  ;;  %v421_v48 = vld [vmem:[%s2192_s1 + $0x20] sm:$0xff]  ;;  %v423_v62 = vld [vmem:[%s2192_s1 + $0x30] sm:$0xff] }
  0x27   : > { %320 = vadd.xlane.f32.xlu0 %v319_v34  ;;  %v424_v2 = vld [vmem:[%s2192_s1 + $0x38] sm:$0xff]  ;;  %v425_v10 = vld [vmem:[%s2192_s1 + $0x40] sm:$0xff]  ;;  %v426_v14 = vld [vmem:[%s2192_s1 + $0x48] sm:$0xff] }
  0x28   : > { %323 = vadd.xlane.f32.xlu1 %v322_v35  ;;  %v417_v35 = vld [vmem:[%s2192_s1] sm:$0xff]  ;;  %v427_v22 = vld [vmem:[%s2192_s1 + $0x50] sm:$0xff]  ;;  %v428_v26 = vld [vmem:[%s2192_s1 + $0x58] sm:$0xff] }
  0x2b   : > { %326 = vadd.xlane.f32.xlu0 %v325_v40 }
  0x2c   : > { %329 = vadd.xlane.f32.xlu1 %v328_v41 }
  0x2f   : > { %332 = vadd.xlane.f32.xlu0 %v331_v46 }
  0x30   : > { %335 = vadd.xlane.f32.xlu1 %v334_v47 }
  0x33   : > { %338 = vadd.xlane.f32.xlu0 %v337_v52 }
  0x34   : > { %341 = vadd.xlane.f32.xlu1 %v340_v53  ;;  %v422_v53 = vld [vmem:[%s2192_s1 + $0x28] sm:$0xff] }
  0x37   : > { %344 = vadd.xlane.f32.xlu0 %v343_v58 }
  0x38   : > { %347 = vadd.xlane.f32.xlu1 %v346_v59 }
  0x3b   : > { %350 = vadd.xlane.f32.xlu0 %v349_v0 }
  0x3c   : > { %353 = vadd.xlane.f32.xlu1 %v352_v1 }
  0x3f   : > { %356 = vadd.xlane.f32.xlu0 %v355_v6 }
  0x40   : > { %359 = vadd.xlane.f32.xlu1 %v358_v7 }
  0x43   : > { %362 = vadd.xlane.f32.xlu0 %v361_v12 }
  0x44   : > { %365 = vadd.xlane.f32.xlu1 %v364_v13 }
  0x47   : > { %368 = vadd.xlane.f32.xlu0 %v367_v18 }
  0x48   : > { %371 = vadd.xlane.f32.xlu1 %v370_v19 }
  0x4b   : > { %374 = vadd.xlane.f32.xlu0 %v373_v24 }
  0x4c   : > { %377 = vadd.xlane.f32.xlu1 %v376_v25 }
  0x4f   : > { %380 = vadd.xlane.f32.xlu0 %v379_v30 }
  0x50   : > { %383 = vadd.xlane.f32.xlu1 %v382_v31 }
  0xa0   : > { %v291_v32 = vpop.xlane.xlu0 %290 }
  0xa1   : > { %v385_v33 = vmul.f32 0.00390625, %v291_v32  ;;  %v297_v34 = vpop.xlane.xlu1 %296 }
  0xa2   : > { %v387_v36 = vmul.f32 0.00390625, %v297_v34  ;;  %v429_v34 = vld [vmem:[%s2192_s1 + $0x60] sm:$0xff] }
  0xa3   : > { %v449_v40 = vmul.f32 %v417_v35, %v385_v33 }
  0xa4   : > { %v294_v39 = vpop.xlane.xlu0 %293  ;;  %v451_v45 = vmul.f32 %v419_v37, %v387_v36 }
  0xa5   : > { %v386_v41 = vmul.f32 0.00390625, %v294_v39  ;;  %v300_v43 = vpop.xlane.xlu1 %299  ;;  %v482_v50 = vsel %vm481_vm0, %v449_v40, 0.0 }
  0xa6   : > { %v388_v44 = vmul.f32 0.00390625, %v300_v43  ;;  %v485_v57 = vsel %vm481_vm0, %v451_v45, 0.0 }
  0xa7   : > { %v450_v46 = vmul.f32 %v418_v38, %v386_v41  ;;  %v430_v38 = vld [vmem:[%s2192_s1 + $0x68] sm:$0xff] }
  0xa8   : > { %v452_v47 = vmul.f32 %v420_v42, %v388_v44  ;;  %v303_v49 = vpop.xlane.xlu0 %302 }
  0xa9   : > { %v483_v51 = vsel %vm481_vm0, %v450_v46, 0.0  ;;  %v389_v52 = vmul.f32 0.00390625, %v303_v49  ;;  %v306_v54 = vpop.xlane.xlu1 %305  ;;  %v431_v46 = vld [vmem:[%s2192_s1 + $0x70] sm:$0xff] }
  0xaa   : > { %v484_v55 = vadd.f32 %v483_v51, %v482_v50  ;;  %v390_v56 = vmul.f32 0.00390625, %v306_v54  ;;  %v487_v58 = vsel %vm481_vm0, %v452_v47, 0.0  ;;  %v432_v50 = vld [vmem:[%s2192_s1 + $0x78] sm:$0xff] }
  0xab   : > { %v453_v59 = vmul.f32 %v421_v48, %v389_v52 }
  0xac   : > { %v486_v60 = vadd.f32 %v485_v57, %v484_v55  ;;  %v454_v61 = vmul.f32 %v422_v53, %v390_v56  ;;  %v309_v63 = vpop.xlane.xlu0 %308 }
  0xad   : > { %v489_v0 = vsel %vm481_vm0, %v453_v59, 0.0  ;;  %v391_v1 = vmul.f32 0.00390625, %v309_v63  ;;  %v312_v3 = vpop.xlane.xlu1 %311 }
  0xae   : > { %v488_v4 = vadd.f32 %v487_v58, %v486_v60  ;;  %v392_v5 = vmul.f32 0.00390625, %v312_v3  ;;  %v491_v6 = vsel %vm481_vm0, %v454_v61, 0.0  ;;  %v433_v58 = vld [vmem:[%s2192_s1 + $0x80] sm:$0xff] }
  0xaf   : > { %v455_v7 = vmul.f32 %v423_v62, %v391_v1  ;;  %v434_v62 = vld [vmem:[%s2192_s1 + $0x88] sm:$0xff] }
  0xb0   : > { %v490_v8 = vadd.f32 %v489_v0, %v488_v4  ;;  %v456_v9 = vmul.f32 %v424_v2, %v392_v5  ;;  %v315_v11 = vpop.xlane.xlu0 %314 }
  0xb1   : > { %v493_v12 = vsel %vm481_vm0, %v455_v7, 0.0  ;;  %v393_v13 = vmul.f32 0.00390625, %v315_v11  ;;  %v318_v15 = vpop.xlane.xlu1 %317 }
  0xb2   : > { %v492_v16 = vadd.f32 %v491_v6, %v490_v8  ;;  %v394_v17 = vmul.f32 0.00390625, %v318_v15  ;;  %v495_v18 = vsel %vm481_vm0, %v456_v9, 0.0  ;;  %v435_v6 = vld [vmem:[%s2192_s1 + $0x90] sm:$0xff] }
  0xb3   : > { %v457_v19 = vmul.f32 %v425_v10, %v393_v13  ;;  %v436_v10 = vld [vmem:[%s2192_s1 + $0x98] sm:$0xff] }
  0xb4   : > { %v494_v20 = vadd.f32 %v493_v12, %v492_v16  ;;  %v458_v21 = vmul.f32 %v426_v14, %v394_v17  ;;  %v321_v23 = vpop.xlane.xlu0 %320 }
  0xb5   : > { %v497_v24 = vsel %vm481_vm0, %v457_v19, 0.0  ;;  %v395_v25 = vmul.f32 0.00390625, %v321_v23  ;;  %v324_v27 = vpop.xlane.xlu1 %323 }
  0xb6   : > { %v496_v28 = vadd.f32 %v495_v18, %v494_v20  ;;  %v396_v29 = vmul.f32 0.00390625, %v324_v27  ;;  %v499_v30 = vsel %vm481_vm0, %v458_v21, 0.0  ;;  %v437_v18 = vld [vmem:[%s2192_s1 + $0xa0] sm:$0xff] }
  0xb7   : > { %v459_v31 = vmul.f32 %v427_v22, %v395_v25  ;;  %v438_v22 = vld [vmem:[%s2192_s1 + $0xa8] sm:$0xff] }
  0xb8   : > { %v498_v32 = vadd.f32 %v497_v24, %v496_v28  ;;  %v460_v33 = vmul.f32 %v428_v26, %v396_v29  ;;  %v327_v35 = vpop.xlane.xlu0 %326 }
  0xb9   : > { %v501_v36 = vsel %vm481_vm0, %v459_v31, 0.0  ;;  %v397_v37 = vmul.f32 0.00390625, %v327_v35  ;;  %v330_v39 = vpop.xlane.xlu1 %329 }
  0xba   : > { %v500_v40 = vadd.f32 %v499_v30, %v498_v32  ;;  %v398_v41 = vmul.f32 0.00390625, %v330_v39  ;;  %v503_v42 = vsel %vm481_vm0, %v460_v33, 0.0  ;;  %v439_v30 = vld [vmem:[%s2192_s1 + $0xb0] sm:$0xff] }
  0xbb   : > { %v461_v43 = vmul.f32 %v429_v34, %v397_v37  ;;  %v440_v34 = vld [vmem:[%s2192_s1 + $0xb8] sm:$0xff] }
  0xbc   : > { %v502_v44 = vadd.f32 %v501_v36, %v500_v40  ;;  %v462_v45 = vmul.f32 %v430_v38, %v398_v41  ;;  %v333_v47 = vpop.xlane.xlu0 %332 }
  0xbd   : > { %v505_v48 = vsel %vm481_vm0, %v461_v43, 0.0  ;;  %v399_v49 = vmul.f32 0.00390625, %v333_v47  ;;  %v336_v51 = vpop.xlane.xlu1 %335 }
  0xbe   : > { %v504_v52 = vadd.f32 %v503_v42, %v502_v44  ;;  %v400_v53 = vmul.f32 0.00390625, %v336_v51  ;;  %v507_v54 = vsel %vm481_vm0, %v462_v45, 0.0  ;;  %v441_v42 = vld [vmem:[%s2192_s1 + $0xc0] sm:$0xff] }
  0xbf   : > { %v463_v55 = vmul.f32 %v431_v46, %v399_v49  ;;  %v442_v46 = vld [vmem:[%s2192_s1 + $0xc8] sm:$0xff] }
  0xc0   : > { %v506_v56 = vadd.f32 %v505_v48, %v504_v52  ;;  %v464_v57 = vmul.f32 %v432_v50, %v400_v53  ;;  %v339_v59 = vpop.xlane.xlu0 %338 }
  0xc1   : > { %v509_v60 = vsel %vm481_vm0, %v463_v55, 0.0  ;;  %v401_v61 = vmul.f32 0.00390625, %v339_v59  ;;  %v342_v63 = vpop.xlane.xlu1 %341 }
  0xc2   : > { %v508_v0 = vadd.f32 %v507_v54, %v506_v56  ;;  %v402_v1 = vmul.f32 0.00390625, %v342_v63  ;;  %v511_v2 = vsel %vm481_vm0, %v464_v57, 0.0  ;;  %v443_v54 = vld [vmem:[%s2192_s1 + $0xd0] sm:$0xff] }
  0xc3   : > { %v465_v3 = vmul.f32 %v433_v58, %v401_v61  ;;  %v444_v58 = vld [vmem:[%s2192_s1 + $0xd8] sm:$0xff] }
  0xc4   : > { %v510_v4 = vadd.f32 %v509_v60, %v508_v0  ;;  %v466_v5 = vmul.f32 %v434_v62, %v402_v1  ;;  %v345_v7 = vpop.xlane.xlu0 %344 }
  0xc5   : > { %v513_v8 = vsel %vm481_vm0, %v465_v3, 0.0  ;;  %v403_v9 = vmul.f32 0.00390625, %v345_v7  ;;  %v348_v11 = vpop.xlane.xlu1 %347 }
  0xc6   : > { %v512_v12 = vadd.f32 %v511_v2, %v510_v4  ;;  %v404_v13 = vmul.f32 0.00390625, %v348_v11  ;;  %v515_v14 = vsel %vm481_vm0, %v466_v5, 0.0  ;;  %v445_v2 = vld [vmem:[%s2192_s1 + $0xe0] sm:$0xff] }
  0xc7   : > { %v467_v15 = vmul.f32 %v435_v6, %v403_v9  ;;  %v446_v6 = vld [vmem:[%s2192_s1 + $0xe8] sm:$0xff] }
  0xc8   : > { %v514_v16 = vadd.f32 %v513_v8, %v512_v12  ;;  %v468_v17 = vmul.f32 %v436_v10, %v404_v13  ;;  %v351_v19 = vpop.xlane.xlu0 %350 }
  0xc9   : > { %v517_v20 = vsel %vm481_vm0, %v467_v15, 0.0  ;;  %v405_v21 = vmul.f32 0.00390625, %v351_v19  ;;  %v354_v23 = vpop.xlane.xlu1 %353 }
  0xca   : > { %v516_v24 = vadd.f32 %v515_v14, %v514_v16  ;;  %v406_v25 = vmul.f32 0.00390625, %v354_v23  ;;  %v519_v26 = vsel %vm481_vm0, %v468_v17, 0.0  ;;  %v447_v14 = vld [vmem:[%s2192_s1 + $0xf0] sm:$0xff] }
  0xcb   : > { %v469_v27 = vmul.f32 %v437_v18, %v405_v21  ;;  %v448_v18 = vld [vmem:[%s2192_s1 + $0xf8] sm:$0xff] }
  0xcc   : > { %v518_v28 = vadd.f32 %v517_v20, %v516_v24  ;;  %v470_v29 = vmul.f32 %v438_v22, %v406_v25  ;;  %v357_v31 = vpop.xlane.xlu0 %356 }
  0xcd   : > { %v521_v32 = vsel %vm481_vm0, %v469_v27, 0.0  ;;  %v407_v33 = vmul.f32 0.00390625, %v357_v31  ;;  %v360_v35 = vpop.xlane.xlu1 %359 }
  0xce   : > { %v520_v36 = vadd.f32 %v519_v26, %v518_v28  ;;  %v408_v37 = vmul.f32 0.00390625, %v360_v35  ;;  %v523_v38 = vsel %vm481_vm0, %v470_v29, 0.0 }
  0xcf   : > { %v471_v39 = vmul.f32 %v439_v30, %v407_v33 }
  0xd0   : > { %v522_v40 = vadd.f32 %v521_v32, %v520_v36  ;;  %v472_v41 = vmul.f32 %v440_v34, %v408_v37  ;;  %v363_v43 = vpop.xlane.xlu0 %362  ;;  %v551_v36 = vld [vmem:[%s2193_s2] sm:$0x1] }
  0xd1   : > { %v525_v44 = vsel %vm481_vm0, %v471_v39, 0.0  ;;  %v409_v45 = vmul.f32 0.00390625, %v363_v43  ;;  %v366_v47 = vpop.xlane.xlu1 %365  ;;  %v592_v43 = vlaneseq }
  0xd2   : > { %v524_v48 = vadd.f32 %v523_v38, %v522_v40  ;;  %v410_v49 = vmul.f32 0.00390625, %v366_v47  ;;  %v527_v50 = vsel %vm481_vm0, %v472_v41, 0.0 }
  0xd3   : > { %v473_v51 = vmul.f32 %v441_v42, %v409_v45 }
  0xd4   : > { %v526_v52 = vadd.f32 %v525_v44, %v524_v48  ;;  %v474_v53 = vmul.f32 %v442_v46, %v410_v49  ;;  %v369_v55 = vpop.xlane.xlu0 %368  ;;  %v593_v44 = vshrl.u32 %v592_v43, 7  ;;  %v561_v48 = vld [vmem:[%s2194_s3 + $0x8] sm:$0xff]  ;;  %v560_v49 = vld [vmem:[%s2194_s3] sm:$0xff] }
  0xd5   : > { %v529_v56 = vsel %vm481_vm0, %v473_v51, 0.0  ;;  %v411_v57 = vmul.f32 0.00390625, %v369_v55  ;;  %v372_v59 = vpop.xlane.xlu1 %371  ;;  %v563_v51 = vld [vmem:[%s2194_s3 + $0x18] sm:$0xff]  ;;  %v581_v43 = vld [vmem:[%s2194_s3 + $0xa8] sm:$0xff] }
  0xd6   : > { %v528_v60 = vadd.f32 %v527_v50, %v526_v52  ;;  %v412_v61 = vmul.f32 0.00390625, %v372_v59  ;;  %v531_v62 = vsel %vm481_vm0, %v474_v53, 0.0  ;;  %v594_v45 = vsub.s32 0, %v593_v44  ;;  %v562_v52 = vld [vmem:[%s2194_s3 + $0x10] sm:$0xff]  ;;  %v565_v59 = vld [vmem:[%s2194_s3 + $0x28] sm:$0xff]  ;;  %v580_v44 = vld [vmem:[%s2194_s3 + $0xa0] sm:$0xff] }
  0xd7   : > { %v475_v63 = vmul.f32 %v443_v54, %v411_v57 }
  0xd8   : > { %v530_v0 = vadd.f32 %v529_v56, %v528_v60  ;;  %v476_v1 = vmul.f32 %v444_v58, %v412_v61  ;;  %v375_v3 = vpop.xlane.xlu0 %374  ;;  %v564_v60 = vld [vmem:[%s2194_s3 + $0x20] sm:$0xff] }
  0xd9   : > { %v533_v4 = vsel %vm481_vm0, %v475_v63, 0.0  ;;  %v413_v5 = vmul.f32 0.00390625, %v375_v3  ;;  %v378_v7 = vpop.xlane.xlu1 %377 }
  0xda   : > { %v532_v8 = vadd.f32 %v531_v62, %v530_v0  ;;  %v414_v9 = vmul.f32 0.00390625, %v378_v7  ;;  %v535_v10 = vsel %vm481_vm0, %v476_v1, 0.0  ;;  %v567_v1 = vld [vmem:[%s2194_s3 + $0x38] sm:$0xff]  ;;  %v569_v7 = vld [vmem:[%s2194_s3 + $0x48] sm:$0xff] }
  0xdb   : > { %v477_v11 = vmul.f32 %v445_v2, %v413_v5  ;;  %v566_v2 = vld [vmem:[%s2194_s3 + $0x30] sm:$0xff] }
  0xdc   : > { %v534_v12 = vadd.f32 %v533_v4, %v532_v8  ;;  %v478_v13 = vmul.f32 %v446_v6, %v414_v9  ;;  %v381_v15 = vpop.xlane.xlu0 %380  ;;  %v568_v8 = vld [vmem:[%s2194_s3 + $0x40] sm:$0xff] }
  0xdd   : > { %v537_v16 = vsel %vm481_vm0, %v477_v11, 0.0  ;;  %v415_v17 = vmul.f32 0.00390625, %v381_v15  ;;  %v384_v19 = vpop.xlane.xlu1 %383 }
  0xde   : > { %v536_v20 = vadd.f32 %v535_v10, %v534_v12  ;;  %v416_v21 = vmul.f32 0.00390625, %v384_v19  ;;  %v539_v22 = vsel %vm481_vm0, %v478_v13, 0.0  ;;  %v571_v13 = vld [vmem:[%s2194_s3 + $0x58] sm:$0xff]  ;;  %v573_v19 = vld [vmem:[%s2194_s3 + $0x68] sm:$0xff] }
  0xdf   : > { %v479_v23 = vmul.f32 %v447_v14, %v415_v17  ;;  %v570_v14 = vld [vmem:[%s2194_s3 + $0x50] sm:$0xff] }
  0xe0   : > { %v538_v24 = vadd.f32 %v537_v16, %v536_v20  ;;  %v480_v25 = vmul.f32 %v448_v18, %v416_v21  ;;  %v572_v20 = vld [vmem:[%s2194_s3 + $0x60] sm:$0xff] }
  0xe1   : > { %v541_v26 = vsel %vm481_vm0, %v479_v23, 0.0 }
  0xe2   : > { %v540_v27 = vadd.f32 %v539_v22, %v538_v24  ;;  %v543_v28 = vsel %vm481_vm0, %v480_v25, 0.0  ;;  %v575_v25 = vld [vmem:[%s2194_s3 + $0x78] sm:$0xff] }
  0xe4   : > { %v542_v29 = vadd.f32 %v541_v26, %v540_v27  ;;  %v574_v26 = vld [vmem:[%s2194_s3 + $0x70] sm:$0xff] }
  0xe6   : > { %v544_v30 = vadd.f32 %v543_v28, %v542_v29 }
  0xe8   : > { %v545_v31 = vrot.slane %v544_v30, 4 }
  0xea   : > { %v546_v32 = vadd.f32 %v545_v31, %v544_v30  ;;  %v577_v31 = vld [vmem:[%s2194_s3 + $0x88] sm:$0xff] }
  0xec   : > { %v547_v33 = vrot.slane %v546_v32, 2 }
  0xee   : > { %v548_v34 = vadd.f32 %v547_v33, %v546_v32  ;;  %v576_v32 = vld [vmem:[%s2194_s3 + $0x80] sm:$0xff] }
  0xf0   : > { %v549_v35 = vrot.slane %v548_v34, 1 }
  0xf2   : > { %v550_v37 = vadd.f32 %v549_v35, %v548_v34 }
  0xf4   : > { %v552_v38 = vadd.f32 %v551_v36, %v550_v37  ;;  %v579_v37 = vld [vmem:[%s2194_s3 + $0x98] sm:$0xff] }
  0xf6   : > { %v553_v39 = vsub.f32 0.0, %v552_v38 }
  0xf8   : > { %v554_v40 = vmul.f32 1.442695, %v553_v39 }
  0xfa   : > { %1347 = vpow2.f32 %v554_v40 }
 0x104   : > { %v1348_v41 = vpop.eup %1347 }
 0x105   : > { %v556_v42 = vadd.f32 1.0, %v1348_v41 }
 0x107   : > { %1349 = vrcp.f32 %v556_v42 }
 0x111   : > { %v1350_v46 = vpop.eup %1349 }
 0x112   : > { %v559_v47 = vmul.f32 %v1350_v46, %v552_v38  ;;  %v578_v38 = vld [vmem:[%s2194_s3 + $0x90] sm:$0xff] }
 0x114   : > { %v1801_v50 = vrot.slane %v559_v47, %v594_v45 }
 0x116   : > { %v597_v53 = vmul.f32 %v1801_v50, %v561_v48  ;;  %v596_v54 = vmul.f32 %v1801_v50, %v560_v49  ;;  %v599_v57 = vmul.f32 %v1801_v50, %v563_v51  ;;  %v598_v58 = vmul.f32 %v1801_v50, %v562_v52  ;;  %v583_v49 = vld [vmem:[%s2194_s3 + $0xb8] sm:$0xff]  ;;  %v582_v51 = vld [vmem:[%s2194_s3 + $0xb0] sm:$0xff] }
 0x117   : > { %v601_v63 = vmul.f32 %v1801_v50, %v565_v59  ;;  %v600_v0 = vmul.f32 %v1801_v50, %v564_v60  ;;  %v603_v5 = vmul.f32 %v1801_v50, %v567_v1  ;;  %v602_v6 = vmul.f32 %v1801_v50, %v566_v2 }
 0x118   : > { %v631_v55 = vsel %vm481_vm0, %v597_v53, 0.0  ;;  %v628_v56 = vsel %vm481_vm0, %v596_v54, 0.0  ;;  %v637_v61 = vsel %vm481_vm0, %v599_v57, 0.0  ;;  %v634_v62 = vsel %vm481_vm0, %v598_v58, 0.0  ;;  %v584_v57 = vld [vmem:[%s2194_s3 + $0xc0] sm:$0xff] }
 0x119   : > { %632 = vadd.xlane.f32.xlu1 %v631_v55  ;;  %629 = vadd.xlane.f32.xlu0 %v628_v56  ;;  %v643_v3 = vsel %vm481_vm0, %v601_v63, 0.0  ;;  %v640_v4 = vsel %vm481_vm0, %v600_v0, 0.0  ;;  %v649_v9 = vsel %vm481_vm0, %v603_v5, 0.0  ;;  %v646_v10 = vsel %vm481_vm0, %v602_v6, 0.0  ;;  %v585_v56 = vld [vmem:[%s2194_s3 + $0xc8] sm:$0xff]  ;;  %v586_v63 = vld [vmem:[%s2194_s3 + $0xd0] sm:$0xff] }
 0x11a   : > { %v605_v11 = vmul.f32 %v1801_v50, %v569_v7  ;;  %v604_v12 = vmul.f32 %v1801_v50, %v568_v8  ;;  %v607_v17 = vmul.f32 %v1801_v50, %v571_v13  ;;  %v606_v18 = vmul.f32 %v1801_v50, %v570_v14  ;;  %v588_v5 = vld [vmem:[%s2194_s3 + $0xe0] sm:$0xff] }
 0x11b   : > { %v609_v23 = vmul.f32 %v1801_v50, %v573_v19  ;;  %v608_v24 = vmul.f32 %v1801_v50, %v572_v20  ;;  %v611_v29 = vmul.f32 %v1801_v50, %v575_v25  ;;  %v610_v30 = vmul.f32 %v1801_v50, %v574_v26  ;;  %v725_v19 = vld [vmem:[%s2195_s4 + $0x8] sm:$0xff]  ;;  %v724_v20 = vld [vmem:[%s2195_s4] sm:$0xff]  ;;  %v726_v25 = vld [vmem:[%s2195_s4 + $0x10] sm:$0xff] }
 0x11c   : > { %v655_v15 = vsel %vm481_vm0, %v605_v11, 0.0  ;;  %v652_v16 = vsel %vm481_vm0, %v604_v12, 0.0  ;;  %v661_v21 = vsel %vm481_vm0, %v607_v17, 0.0  ;;  %v658_v22 = vsel %vm481_vm0, %v606_v18, 0.0  ;;  %v590_v11 = vld [vmem:[%s2194_s3 + $0xf0] sm:$0xff] }
 0x11d   : > { %638 = vadd.xlane.f32.xlu1 %v637_v61  ;;  %635 = vadd.xlane.f32.xlu0 %v634_v62  ;;  %v667_v27 = vsel %vm481_vm0, %v609_v23, 0.0  ;;  %v664_v28 = vsel %vm481_vm0, %v608_v24, 0.0  ;;  %v673_v33 = vsel %vm481_vm0, %v611_v29, 0.0  ;;  %v670_v34 = vsel %vm481_vm0, %v610_v30, 0.0  ;;  %v587_v62 = vld [vmem:[%s2194_s3 + $0xd8] sm:$0xff] }
 0x11e   : > { %v613_v35 = vmul.f32 %v1801_v50, %v577_v31  ;;  %v612_v36 = vmul.f32 %v1801_v50, %v576_v32  ;;  %v615_v41 = vmul.f32 %v1801_v50, %v579_v37  ;;  %v614_v42 = vmul.f32 %v1801_v50, %v578_v38  ;;  %v727_v24 = vld [vmem:[%s2195_s4 + $0x18] sm:$0xff] }
 0x11f   : > { %v617_v47 = vmul.f32 %v1801_v50, %v581_v43  ;;  %v616_v48 = vmul.f32 %v1801_v50, %v580_v44  ;;  %v619_v54 = vmul.f32 %v1801_v50, %v583_v49  ;;  %v618_v55 = vmul.f32 %v1801_v50, %v582_v51  ;;  %v731_v44 = vld [vmem:[%s2195_s4 + $0x38] sm:$0xff] }
 0x120   : > { %v679_v39 = vsel %vm481_vm0, %v613_v35, 0.0  ;;  %v676_v40 = vsel %vm481_vm0, %v612_v36, 0.0  ;;  %v685_v45 = vsel %vm481_vm0, %v615_v41, 0.0  ;;  %v682_v46 = vsel %vm481_vm0, %v614_v42, 0.0  ;;  %v728_v35 = vld [vmem:[%s2195_s4 + $0x20] sm:$0xff] }
 0x121   : > { %644 = vadd.xlane.f32.xlu1 %v643_v3  ;;  %641 = vadd.xlane.f32.xlu0 %v640_v4  ;;  %v691_v52 = vsel %vm481_vm0, %v617_v47, 0.0  ;;  %v688_v53 = vsel %vm481_vm0, %v616_v48, 0.0  ;;  %v697_v58 = vsel %vm481_vm0, %v619_v54, 0.0  ;;  %v694_v59 = vsel %vm481_vm0, %v618_v55, 0.0  ;;  %v589_v4 = vld [vmem:[%s2194_s3 + $0xe8] sm:$0xff] }
 0x122   : > { %v621_v60 = vmul.f32 %v1801_v50, %v585_v56  ;;  %v620_v61 = vmul.f32 %v1801_v50, %v584_v57  ;;  %v623_v2 = vmul.f32 %v1801_v50, %v587_v62  ;;  %v622_v3 = vmul.f32 %v1801_v50, %v586_v63  ;;  %v733_v55 = vld [vmem:[%s2195_s4 + $0x48] sm:$0xff]  ;;  %v732_v56 = vld [vmem:[%s2195_s4 + $0x40] sm:$0xff] }
 0x123   : > { %v625_v8 = vmul.f32 %v1801_v50, %v589_v4 }
 0x124   : > { %v703_v0 = vsel %vm481_vm0, %v621_v60, 0.0  ;;  %v700_v1 = vsel %vm481_vm0, %v620_v61, 0.0  ;;  %v709_v6 = vsel %vm481_vm0, %v623_v2, 0.0  ;;  %v706_v7 = vsel %vm481_vm0, %v622_v3, 0.0  ;;  %v735_v3 = vld [vmem:[%s2195_s4 + $0x58] sm:$0xff] }
 0x125   : > { %650 = vadd.xlane.f32.xlu1 %v649_v9  ;;  %647 = vadd.xlane.f32.xlu0 %v646_v10  ;;  %v624_v9 = vmul.f32 %v1801_v50, %v588_v5  ;;  %v591_v10 = vld [vmem:[%s2194_s3 + $0xf8] sm:$0xff]  ;;  %v715_v13 = vsel %vm481_vm0, %v625_v8, 0.0 }
 0x126   : > { %v627_v12 = vmul.f32 %v1801_v50, %v591_v10 }
 0x127   : > { %v712_v14 = vsel %vm481_vm0, %v624_v9, 0.0 }
 0x128   : > { %v721_v17 = vsel %vm481_vm0, %v627_v12, 0.0 }
 0x129   : > { %656 = vadd.xlane.f32.xlu1 %v655_v15  ;;  %653 = vadd.xlane.f32.xlu0 %v652_v16  ;;  %v626_v15 = vmul.f32 %v1801_v50, %v590_v11  ;;  %v1551_v16 = vmov 0  }
 0x12a   : > { %1346 = vset.pattern.permute.xlu1 %v1551_v16  ;;  %1345 = vset.pattern.permute.xlu0 %v1551_v16  ;;  %v737_v16 = vld [vmem:[%s2195_s4 + $0x68] sm:$0xff] }
 0x12b   : > { %v718_v18 = vsel %vm481_vm0, %v626_v15, 0.0 }
 0x12d   : > { %662 = vadd.xlane.f32.xlu1 %v661_v21  ;;  %659 = vadd.xlane.f32.xlu0 %v658_v22 }
 0x131   : > { %668 = vadd.xlane.f32.xlu1 %v667_v27  ;;  %665 = vadd.xlane.f32.xlu0 %v664_v28 }
 0x135   : > { %674 = vadd.xlane.f32.xlu1 %v673_v33  ;;  %671 = vadd.xlane.f32.xlu0 %v670_v34  ;;  %v729_v34 = vld [vmem:[%s2195_s4 + $0x28] sm:$0xff] }
 0x139   : > { %680 = vadd.xlane.f32.xlu1 %v679_v39  ;;  %677 = vadd.xlane.f32.xlu0 %v676_v40 }
 0x13d   : > { %686 = vadd.xlane.f32.xlu1 %v685_v45  ;;  %683 = vadd.xlane.f32.xlu0 %v682_v46  ;;  %v730_v45 = vld [vmem:[%s2195_s4 + $0x30] sm:$0xff] }
 0x141   : > { %692 = vadd.xlane.f32.xlu1 %v691_v52  ;;  %689 = vadd.xlane.f32.xlu0 %v688_v53 }
 0x145   : > { %698 = vadd.xlane.f32.xlu1 %v697_v58  ;;  %695 = vadd.xlane.f32.xlu0 %v694_v59 }
 0x149   : > { %704 = vadd.xlane.f32.xlu1 %v703_v0  ;;  %701 = vadd.xlane.f32.xlu0 %v700_v1 }
 0x14d   : > { %710 = vadd.xlane.f32.xlu1 %v709_v6  ;;  %707 = vadd.xlane.f32.xlu0 %v706_v7  ;;  %v734_v6 = vld [vmem:[%s2195_s4 + $0x50] sm:$0xff] }
 0x151   : > { %716 = vadd.xlane.f32.xlu1 %v715_v13  ;;  %713 = vadd.xlane.f32.xlu0 %v712_v14 }
 0x155   : > { %722 = vadd.xlane.f32.xlu1 %v721_v17  ;;  %719 = vadd.xlane.f32.xlu0 %v718_v18  ;;  %v736_v17 = vld [vmem:[%s2195_s4 + $0x60] sm:$0xff] }
 0x1a6   : > { %v633_v50 = vpop.xlane.xlu1 %632  ;;  %v630_v21 = vpop.xlane.xlu0 %629 }
 0x1a7   : > { %v757_v22 = vadd.f32 %v725_v19, %v633_v50  ;;  %v756_v23 = vadd.f32 %v724_v20, %v630_v21 }
 0x1a9   : > { %v789_v26 = vsub.f32 0.0, %v757_v22  ;;  %v788_v27 = vsub.f32 0.0, %v756_v23 }
 0x1aa   : > { %v639_v28 = vpop.xlane.xlu1 %638  ;;  %v636_v29 = vpop.xlane.xlu0 %635 }
 0x1ab   : > { %v822_v30 = vmul.f32 1.442695, %v789_v26  ;;  %v820_v31 = vmul.f32 1.442695, %v788_v27  ;;  %v759_v32 = vadd.f32 %v727_v24, %v639_v28  ;;  %v758_v33 = vadd.f32 %v726_v25, %v636_v29  ;;  %v739_v29 = vld [vmem:[%s2195_s4 + $0x78] sm:$0xff] }
 0x1ad   : > { %1351 = vpow2.f32 %v822_v30  ;;  %v791_v36 = vsub.f32 0.0, %v759_v32  ;;  %v790_v37 = vsub.f32 0.0, %v758_v33  ;;  %v738_v32 = vld [vmem:[%s2195_s4 + $0x70] sm:$0xff] }
 0x1ae   : > { %1353 = vpow2.f32 %v820_v31  ;;  %v645_v38 = vpop.xlane.xlu1 %644  ;;  %v642_v39 = vpop.xlane.xlu0 %641 }
 0x1af   : > { %v826_v40 = vmul.f32 1.442695, %v791_v36  ;;  %v824_v41 = vmul.f32 1.442695, %v790_v37  ;;  %v761_v42 = vadd.f32 %v729_v34, %v645_v38  ;;  %v760_v43 = vadd.f32 %v728_v35, %v642_v39 }
 0x1b1   : > { %1355 = vpow2.f32 %v826_v40  ;;  %v793_v46 = vsub.f32 0.0, %v761_v42  ;;  %v792_v47 = vsub.f32 0.0, %v760_v43  ;;  %v741_v42 = vld [vmem:[%s2195_s4 + $0x88] sm:$0xff] }
 0x1b2   : > { %1357 = vpow2.f32 %v824_v41  ;;  %v651_v48 = vpop.xlane.xlu1 %650  ;;  %v648_v49 = vpop.xlane.xlu0 %647 }
 0x1b3   : > { %v828_v51 = vmul.f32 1.442695, %v792_v47  ;;  %v763_v52 = vadd.f32 %v731_v44, %v651_v48  ;;  %v762_v53 = vadd.f32 %v730_v45, %v648_v49  ;;  %v830_v54 = vmul.f32 1.442695, %v793_v46  ;;  %v740_v46 = vld [vmem:[%s2195_s4 + $0x80] sm:$0xff] }
 0x1b5   : > { %v794_v57 = vsub.f32 0.0, %v762_v53  ;;  %1359 = vpow2.f32 %v828_v51  ;;  %v795_v58 = vsub.f32 0.0, %v763_v52 }
 0x1b6   : > { %v657_v59 = vpop.xlane.xlu1 %656  ;;  %v654_v60 = vpop.xlane.xlu0 %653  ;;  %1361 = vpow2.f32 %v830_v54 }
 0x1b7   : > { %v1352_v61 = vpop.eup %1351  ;;  %v765_v62 = vadd.f32 %v733_v55, %v657_v59  ;;  %v764_v63 = vadd.f32 %v732_v56, %v654_v60  ;;  %v832_v2 = vmul.f32 1.442695, %v794_v57  ;;  %v834_v7 = vmul.f32 1.442695, %v795_v58  ;;  %v743_v59 = vld [vmem:[%s2195_s4 + $0x98] sm:$0xff] }
 0x1b8   : > { %v1354_v0 = vpop.eup %1353  ;;  %v885_v1 = vadd.f32 1.0, %v1352_v61 }
 0x1b9   : > { %v884_v4 = vadd.f32 1.0, %v1354_v0  ;;  %v797_v5 = vsub.f32 0.0, %v765_v62  ;;  %v796_v8 = vsub.f32 0.0, %v764_v63  ;;  %v742_v63 = vld [vmem:[%s2195_s4 + $0x90] sm:$0xff] }
 0x1ba   : > { %1363 = vrcp.f32 %v885_v1  ;;  %v663_v9 = vpop.xlane.xlu1 %662  ;;  %v660_v10 = vpop.xlane.xlu0 %659 }
 0x1bb   : > { %v1356_v11 = vpop.eup %1355  ;;  %1365 = vrcp.f32 %v884_v4  ;;  %v838_v12 = vmul.f32 1.442695, %v797_v5  ;;  %v767_v13 = vadd.f32 %v735_v3, %v663_v9  ;;  %v766_v15 = vadd.f32 %v734_v6, %v660_v10  ;;  %v745_v10 = vld [vmem:[%s2195_s4 + $0xa8] sm:$0xff] }
 0x1bc   : > { %v1358_v14 = vpop.eup %1357  ;;  %1367 = vpow2.f32 %v832_v2  ;;  %v887_v20 = vadd.f32 1.0, %v1356_v11  ;;  %v836_v50 = vmul.f32 1.442695, %v796_v8 }
 0x1bd   : > { %v886_v18 = vadd.f32 1.0, %v1358_v14  ;;  %1369 = vpow2.f32 %v838_v12  ;;  %v799_v19 = vsub.f32 0.0, %v767_v13  ;;  %v798_v21 = vsub.f32 0.0, %v766_v15  ;;  %v744_v14 = vld [vmem:[%s2195_s4 + $0xa0] sm:$0xff] }
 0x1be   : > { %1371 = vpow2.f32 %v834_v7  ;;  %v669_v22 = vpop.xlane.xlu1 %668  ;;  %v666_v23 = vpop.xlane.xlu0 %665 }
 0x1bf   : > { %1373 = vrcp.f32 %v886_v18  ;;  %v842_v24 = vmul.f32 1.442695, %v799_v19  ;;  %v769_v25 = vadd.f32 %v737_v16, %v669_v22  ;;  %v768_v26 = vadd.f32 %v736_v17, %v666_v23  ;;  %v1360_v27 = vpop.eup %1359 }
 0x1c0   : > { %v840_v28 = vmul.f32 1.442695, %v798_v21  ;;  %v1362_v33 = vpop.eup %1361  ;;  %v888_v36 = vadd.f32 1.0, %v1360_v27 }
 0x1c1   : > { %1375 = vpow2.f32 %v842_v24  ;;  %v801_v30 = vsub.f32 0.0, %v769_v25  ;;  %v800_v31 = vsub.f32 0.0, %v768_v26  ;;  %v889_v44 = vadd.f32 1.0, %v1362_v33  ;;  %v747_v24 = vld [vmem:[%s2195_s4 + $0xb8] sm:$0xff]  ;;  %v746_v25 = vld [vmem:[%s2195_s4 + $0xb0] sm:$0xff] }
 0x1c2   : > { %1377 = vrcp.f32 %v887_v20  ;;  %v675_v34 = vpop.xlane.xlu1 %674  ;;  %v672_v35 = vpop.xlane.xlu0 %671 }
 0x1c3   : > { %1379 = vpow2.f32 %v836_v50  ;;  %v846_v37 = vmul.f32 1.442695, %v801_v30  ;;  %v771_v38 = vadd.f32 %v739_v29, %v675_v34  ;;  %v844_v40 = vmul.f32 1.442695, %v800_v31 }
 0x1c4   : > { %v1364_v39 = vpop.eup %1363  ;;  %1381 = vpow2.f32 %v840_v28  ;;  %v770_v41 = vadd.f32 %v738_v32, %v672_v35 }
 0x1c5   : > { %v1366_v43 = vpop.eup %1365  ;;  %1383 = vpow2.f32 %v846_v37  ;;  %v803_v45 = vsub.f32 0.0, %v771_v38  ;;  %987 = vperm.xlu1 %1346, %v1364_v39  }
 0x1c6   : > { %v1368_v47 = vpop.eup %1367  ;;  %v802_v48 = vsub.f32 0.0, %v770_v41  ;;  %982 = vperm.xlu0 %1345, %v1366_v43   ;;  %v681_v49 = vpop.xlane.xlu1 %680  ;;  %1385 = vrcp.f32 %v888_v36  ;;  %v748_v43 = vld [vmem:[%s2195_s4 + $0xc0] sm:$0xff] }
 0x1c7   : > { %v678_v51 = vpop.xlane.xlu0 %677  ;;  %v1370_v52 = vpop.eup %1369  ;;  %v850_v53 = vmul.f32 1.442695, %v803_v45  ;;  %v773_v54 = vadd.f32 %v741_v42, %v681_v49  ;;  %1387 = vpow2.f32 %v844_v40  ;;  %v890_v61 = vadd.f32 1.0, %v1368_v47  ;;  %v749_v42 = vld [vmem:[%s2195_s4 + $0xc8] sm:$0xff] }
 0x1c8   : > { %v1372_v55 = vpop.eup %1371  ;;  %v893_v56 = vadd.f32 1.0, %v1370_v52  ;;  %v848_v57 = vmul.f32 1.442695, %v802_v48  ;;  %v772_v58 = vadd.f32 %v740_v46, %v678_v51  ;;  %1389 = vrcp.f32 %v889_v44 }
 0x1c9   : > { %v1374_v60 = vpop.eup %1373  ;;  %v805_v62 = vsub.f32 0.0, %v773_v54  ;;  %v891_v7 = vadd.f32 1.0, %v1372_v55 }
 0x1ca   : > { %1391 = vrcp.f32 %v893_v56  ;;  %v804_v0 = vsub.f32 0.0, %v772_v58  ;;  %992 = vperm.xlu1 %1346, %v1374_v60   ;;  %v687_v1 = vpop.xlane.xlu1 %686  ;;  %v751_v56 = vld [vmem:[%s2195_s4 + $0xd8] sm:$0xff] }
 0x1cb   : > { %v684_v2 = vpop.xlane.xlu0 %683  ;;  %v1376_v3 = vpop.eup %1375  ;;  %1393 = vpow2.f32 %v850_v53  ;;  %v854_v4 = vmul.f32 1.442695, %v805_v62  ;;  %v775_v5 = vadd.f32 %v743_v59, %v687_v1  ;;  %v750_v59 = vld [vmem:[%s2195_s4 + $0xd0] sm:$0xff] }
 0x1cc   : > { %v1378_v6 = vpop.eup %1377  ;;  %v895_v8 = vadd.f32 1.0, %v1376_v3  ;;  %1395 = vpow2.f32 %v848_v57  ;;  %v774_v9 = vadd.f32 %v742_v63, %v684_v2  ;;  %v852_v12 = vmul.f32 1.442695, %v804_v0 }
 0x1cd   : > { %v1380_v11 = vpop.eup %1379  ;;  %1397 = vrcp.f32 %v890_v61  ;;  %v807_v13 = vsub.f32 0.0, %v775_v5 }
 0x1ce   : > { %v1382_v15 = vpop.eup %1381  ;;  %1399 = vrcp.f32 %v895_v8  ;;  %v806_v16 = vsub.f32 0.0, %v774_v9  ;;  %997 = vperm.xlu1 %1346, %v1378_v6   ;;  %v693_v17 = vpop.xlane.xlu1 %692  ;;  %v892_v21 = vadd.f32 1.0, %v1380_v11  ;;  %v753_v8 = vld [vmem:[%s2195_s4 + $0xe8] sm:$0xff] }
 0x1cf   : > { %v690_v18 = vpop.xlane.xlu0 %689  ;;  %v1384_v19 = vpop.eup %1383  ;;  %1401 = vpow2.f32 %v854_v4  ;;  %v858_v20 = vmul.f32 1.442695, %v807_v13  ;;  %v777_v50 = vadd.f32 %v745_v10, %v693_v17  ;;  %v894_v27 = vadd.f32 1.0, %v1382_v15  ;;  %v752_v15 = vld [vmem:[%s2195_s4 + $0xe0] sm:$0xff] }
 0x1d0   : > { %1403 = vrcp.f32 %v891_v7  ;;  %v897_v22 = vadd.f32 1.0, %v1384_v19  ;;  %v776_v23 = vadd.f32 %v744_v14, %v690_v18  ;;  %v1386_v26 = vpop.eup %1385  ;;  %v856_v30 = vmul.f32 1.442695, %v806_v16 }
 0x1d1   : > { %1405 = vpow2.f32 %v852_v12  ;;  %v809_v28 = vsub.f32 0.0, %v777_v50  ;;  %v1388_v29 = vpop.eup %1387 }
 0x1d2   : > { %1407 = vrcp.f32 %v897_v22  ;;  %v808_v31 = vsub.f32 0.0, %v776_v23  ;;  %1002 = vperm.xlu1 %1346, %v1386_v26   ;;  %v699_v32 = vpop.xlane.xlu1 %698  ;;  %v1390_v34 = vpop.eup %1389  ;;  %v896_v40 = vadd.f32 1.0, %v1388_v29  ;;  %v755_v22 = vld [vmem:[%s2195_s4 + $0xf8] sm:$0xff] }
 0x1d3   : > { %v696_v33 = vpop.xlane.xlu0 %695  ;;  %1409 = vpow2.f32 %v858_v20  ;;  %v862_v35 = vmul.f32 1.442695, %v809_v28  ;;  %v779_v36 = vadd.f32 %v747_v24, %v699_v32  ;;  %v754_v32 = vld [vmem:[%s2195_s4 + $0xf0] sm:$0xff] }
 0x1d4   : > { %v778_v37 = vadd.f32 %v746_v25, %v696_v33  ;;  %v1392_v38 = vpop.eup %1391  ;;  %1411 = vrcp.f32 %v892_v21  ;;  %v860_v49 = vmul.f32 1.442695, %v808_v31 }
 0x1d5   : > { %v1394_v39 = vpop.eup %1393  ;;  %1413 = vrcp.f32 %v894_v27  ;;  %v811_v41 = vsub.f32 0.0, %v779_v36  ;;  %1027 = vperm.xlu0 %1345, %v1392_v38  }
 0x1d6   : > { %v1396_v44 = vpop.eup %1395  ;;  %v899_v45 = vadd.f32 1.0, %v1394_v39  ;;  %1415 = vpow2.f32 %v862_v35  ;;  %1007 = vperm.xlu1 %1346, %v1390_v34   ;;  %v705_v46 = vpop.xlane.xlu1 %704  ;;  %v810_v52 = vsub.f32 0.0, %v778_v37 }
 0x1d7   : > { %v702_v47 = vpop.xlane.xlu0 %701  ;;  %v1398_v48 = vpop.eup %1397  ;;  %1417 = vpow2.f32 %v856_v30  ;;  %v866_v51 = vmul.f32 1.442695, %v811_v41  ;;  %v781_v54 = vadd.f32 %v749_v42, %v705_v46  ;;  %v898_v58 = vadd.f32 1.0, %v1396_v44 }
 0x1d8   : > { %v1400_v53 = vpop.eup %1399  ;;  %1419 = vrcp.f32 %v899_v45  ;;  %v780_v55 = vadd.f32 %v748_v43, %v702_v47  ;;  %v864_v2 = vmul.f32 1.442695, %v810_v52 }
 0x1d9   : > { %v1402_v57 = vpop.eup %1401  ;;  %1421 = vrcp.f32 %v896_v40  ;;  %1037 = vperm.xlu0 %1345, %v1400_v53   ;;  %v813_v62 = vsub.f32 0.0, %v781_v54 }
 0x1da   : > { %v1404_v60 = vpop.eup %1403  ;;  %v901_v61 = vadd.f32 1.0, %v1402_v57  ;;  %1423 = vpow2.f32 %v866_v51  ;;  %1012 = vperm.xlu1 %1346, %v1398_v48   ;;  %v711_v63 = vpop.xlane.xlu1 %710  ;;  %v812_v6 = vsub.f32 0.0, %v780_v55 }
 0x1db   : > { %v708_v0 = vpop.xlane.xlu0 %707  ;;  %v1406_v1 = vpop.eup %1405  ;;  %1425 = vpow2.f32 %v860_v49  ;;  %v783_v3 = vadd.f32 %v751_v56, %v711_v63  ;;  %v870_v5 = vmul.f32 1.442695, %v813_v62 }
 0x1dc   : > { %v1408_v4 = vpop.eup %1407  ;;  %1427 = vrcp.f32 %v901_v61  ;;  %v782_v7 = vadd.f32 %v750_v59, %v708_v0  ;;  %v900_v12 = vadd.f32 1.0, %v1406_v1  ;;  %v868_v50 = vmul.f32 1.442695, %v812_v6 }
 0x1dd   : > { %v1410_v9 = vpop.eup %1409  ;;  %1429 = vrcp.f32 %v898_v58  ;;  %v815_v10 = vsub.f32 0.0, %v783_v3  ;;  %1047 = vperm.xlu0 %1345, %v1408_v4  }
 0x1de   : > { %v1412_v11 = vpop.eup %1411  ;;  %v903_v13 = vadd.f32 1.0, %v1410_v9  ;;  %1431 = vpow2.f32 %v870_v5  ;;  %1017 = vperm.xlu1 %1346, %v1404_v60   ;;  %v717_v14 = vpop.xlane.xlu1 %716  ;;  %v814_v21 = vsub.f32 0.0, %v782_v7 }
 0x1df   : > { %v714_v16 = vpop.xlane.xlu0 %713  ;;  %v1414_v17 = vpop.eup %1413  ;;  %1433 = vpow2.f32 %v864_v2  ;;  %v874_v18 = vmul.f32 1.442695, %v815_v10  ;;  %v785_v19 = vadd.f32 %v753_v8, %v717_v14 }
 0x1e0   : > { %v1416_v20 = vpop.eup %1415  ;;  %1435 = vrcp.f32 %v903_v13  ;;  %v784_v26 = vadd.f32 %v752_v15, %v714_v16  ;;  %v872_v38 = vmul.f32 1.442695, %v814_v21  ;;  %v1480_v21 = vld [vmem:[%s1598_s23 + $0x18] sm:$0xff] }
 0x1e1   : > { %v1418_v23 = vpop.eup %1417  ;;  %v905_v24 = vadd.f32 1.0, %v1416_v20  ;;  %1437 = vpow2.f32 %v874_v18  ;;  %v817_v25 = vsub.f32 0.0, %v785_v19  ;;  %v1479_v20 = vld [vmem:[%s1598_s23 + $0x10] sm:$0xff] }
 0x1e2   : > { %v1420_v27 = vpop.eup %1419  ;;  %1439 = vrcp.f32 %v900_v12  ;;  %1022 = vperm.xlu1 %1346, %v1412_v11   ;;  %v723_v28 = vpop.xlane.xlu1 %722  ;;  %v902_v35 = vadd.f32 1.0, %v1418_v23  ;;  %v816_v39 = vsub.f32 0.0, %v784_v26  ;;  %v1482_v26 = vld [vmem:[%s1598_s23 + $0x8] sm:$0xff] }
 0x1e3   : > { %v1422_v29 = vpop.eup %1421  ;;  %1441 = vrcp.f32 %v905_v24  ;;  %v878_v30 = vmul.f32 1.442695, %v817_v25  ;;  %1057 = vperm.xlu0 %1345, %v1420_v27   ;;  %v787_v31 = vadd.f32 %v755_v22, %v723_v28  ;;  %v720_v33 = vpop.xlane.xlu0 %719  ;;  %v1481_v24 = vld [vmem:[%s1598_s23] sm:$0xff] }
 0x1e4   : > { %v1424_v34 = vpop.eup %1423  ;;  %1443 = vpow2.f32 %v868_v50  ;;  %v786_v42 = vadd.f32 %v754_v32, %v720_v33  ;;  %v876_v48 = vmul.f32 1.442695, %v816_v39  ;;  %v1487_v39 = vld [vmem:[%s1598_s23 + $0x40] sm:$0xff] }
 0x1e5   : > { %v1426_v36 = vpop.eup %1425  ;;  %v907_v37 = vadd.f32 1.0, %v1424_v34  ;;  %v819_v40 = vsub.f32 0.0, %v787_v31  ;;  %1445 = vpow2.f32 %v878_v30  ;;  %v1484_v31 = vld [vmem:[%s1598_s23 + $0x28] sm:$0xff]  ;;  %v1485_v34 = vld [vmem:[%s1598_s23 + $0x30] sm:$0xff] }
 0x1e6   : > { %v1428_v41 = vpop.eup %1427  ;;  %1032 = vperm.xlu1 %1346, %v1414_v17   ;;  %v818_v51 = vsub.f32 0.0, %v786_v42  ;;  %v904_v53 = vadd.f32 1.0, %v1426_v36  ;;  %v1486_v36 = vld [vmem:[%s1598_s23 + $0x38] sm:$0xff] }
 0x1e7   : > { %v1430_v43 = vpop.eup %1429  ;;  %1447 = vrcp.f32 %v907_v37  ;;  %v882_v44 = vmul.f32 1.442695, %v819_v40  ;;  %1067 = vperm.xlu0 %1345, %v1428_v41   ;;  %v1488_v41 = vld [vmem:[%s1598_s23 + $0x48] sm:$0xff] }
 0x1e8   : > { %v1432_v45 = vpop.eup %1431  ;;  %1449 = vrcp.f32 %v902_v35  ;;  %v880_v59 = vmul.f32 1.442695, %v818_v51 }
 0x1e9   : > { %v1434_v46 = vpop.eup %1433  ;;  %v909_v47 = vadd.f32 1.0, %v1432_v45  ;;  %1451 = vpow2.f32 %v872_v38  ;;  %v1489_v45 = vld [vmem:[%s1598_s23 + $0x90] sm:$0xff] }
 0x1ea   : > { %v1436_v49 = vpop.eup %1435  ;;  %1453 = vpow2.f32 %v882_v44  ;;  %1042 = vperm.xlu1 %1346, %v1422_v29   ;;  %v906_v57 = vadd.f32 1.0, %v1434_v46  ;;  %v1483_v29 = vld [vmem:[%s1598_s23 + $0x20] sm:$0xff] }
 0x1eb   : > { %v1438_v52 = vpop.eup %1437  ;;  %1455 = vrcp.f32 %v909_v47  ;;  %1077 = vperm.xlu0 %1345, %v1436_v49   ;;  %v1490_v47 = vld [vmem:[%s1598_s23 + $0x98] sm:$0xff]  ;;  %v1491_v49 = vld [vmem:[%s1598_s23 + $0x50] sm:$0xff] }
 0x1ec   : > { %v1440_v54 = vpop.eup %1439  ;;  %v911_v55 = vadd.f32 1.0, %v1438_v52  ;;  %1457 = vpow2.f32 %v876_v48  ;;  %v1492_v52 = vld [vmem:[%s1598_s23 + $0x58] sm:$0xff] }
 0x1ed   : > { %v1442_v56 = vpop.eup %1441 }
 0x1ee   : > { %v1444_v58 = vpop.eup %1443  ;;  %1459 = vrcp.f32 %v911_v55  ;;  %1052 = vperm.xlu1 %1346, %v1430_v43  }
 0x1ef   : > { %1461 = vrcp.f32 %v904_v53  ;;  %1087 = vperm.xlu0 %1345, %v1442_v56   ;;  %v1446_v60 = vpop.eup %1445  ;;  %v908_v0 = vadd.f32 1.0, %v1444_v58  ;;  %v1493_v56 = vld [vmem:[%s1598_s23 + $0xb0] sm:$0xff]  ;;  %v1494_v58 = vld [vmem:[%s1598_s23 + $0xb8] sm:$0xff] }
 0x1f0   : > { %1463 = vrcp.f32 %v906_v57  ;;  %v913_v62 = vadd.f32 1.0, %v1446_v60  ;;  %v1495_v60 = vld [vmem:[%s1598_s23 + $0x60] sm:$0xff] }
 0x1f1   : > { %v1448_v61 = vpop.eup %1447  ;;  %1465 = vpow2.f32 %v880_v59 }
 0x1f2   : > { %v1450_v63 = vpop.eup %1449  ;;  %1062 = vperm.xlu1 %1346, %v1440_v54   ;;  %1467 = vrcp.f32 %v913_v62  ;;  %v1496_v62 = vld [vmem:[%s1598_s23 + $0x68] sm:$0xff] }
 0x1f3   : > { %v1452_v1 = vpop.eup %1451  ;;  %1097 = vperm.xlu0 %1345, %v1448_v61   ;;  %1469 = vrcp.f32 %v908_v0 }
 0x1f4   : > { %v1454_v2 = vpop.eup %1453  ;;  %v910_v6 = vadd.f32 1.0, %v1452_v1 }
 0x1f5   : > { %v1456_v3 = vpop.eup %1455  ;;  %v915_v4 = vadd.f32 1.0, %v1454_v2  ;;  %v1497_v2 = vld [vmem:[%s1598_s23 + $0xd0] sm:$0xff] }
 0x1f6   : > { %1072 = vperm.xlu1 %1346, %v1450_v63   ;;  %v1458_v5 = vpop.eup %1457 }
 0x1f7   : > { %1471 = vrcp.f32 %v915_v4  ;;  %1107 = vperm.xlu0 %1345, %v1456_v3   ;;  %v912_v10 = vadd.f32 1.0, %v1458_v5  ;;  %v1498_v4 = vld [vmem:[%s1598_s23 + $0xd8] sm:$0xff] }
 0x1f8   : > { %v1460_v7 = vpop.eup %1459  ;;  %1473 = vrcp.f32 %v910_v6  ;;  %v1499_v6 = vld [vmem:[%s1598_s23 + $0x70] sm:$0xff] }
 0x1f9   : > { %v1462_v8 = vpop.eup %1461  ;;  %1475 = vrcp.f32 %v912_v10 }
 0x1fa   : > { %1082 = vperm.xlu1 %1346, %v1462_v8   ;;  %v1464_v9 = vpop.eup %1463  ;;  %v1500_v8 = vld [vmem:[%s1598_s23 + $0x78] sm:$0xff] }
 0x1fb   : > { %1117 = vperm.xlu0 %1345, %v1460_v7   ;;  %v1466_v11 = vpop.eup %1465 }
 0x1fc   : > { %v1468_v12 = vpop.eup %1467  ;;  %v914_v13 = vadd.f32 1.0, %v1466_v11  ;;  %v1501_v11 = vld [vmem:[%s1598_s23 + $0x80] sm:$0xff] }
 0x1fd   : > { %v1470_v14 = vpop.eup %1469 }
 0x1fe   : > { %1092 = vperm.xlu1 %1346, %v1464_v9   ;;  %1477 = vrcp.f32 %v914_v13  ;;  %v1502_v13 = vld [vmem:[%s1598_s23 + $0x88] sm:$0xff] }
 0x1ff   : > { %1127 = vperm.xlu0 %1345, %v1468_v12  }
 0x201   : > { %v1472_v15 = vpop.eup %1471 }
 0x202   : > { %1102 = vperm.xlu1 %1346, %v1470_v14   ;;  %v1474_v16 = vpop.eup %1473 }
 0x203   : > { %1137 = vperm.xlu0 %1345, %v1472_v15   ;;  %v1476_v17 = vpop.eup %1475 }
 0x206   : > { %1112 = vperm.xlu1 %1346, %v1474_v16   ;;  %v1503_v16 = vld [vmem:[%s1598_s23 + $0xf0] sm:$0xff] }
 0x208   : > { %v1478_v18 = vpop.eup %1477 }
 0x20a   : > { %1122 = vperm.xlu1 %1346, %v1476_v17  }
 0x20e   : > { %1132 = vperm.xlu1 %1346, %v1478_v18   ;;  %v1504_v18 = vld [vmem:[%s1598_s23 + $0xf8] sm:$0xff] }
 0x244   : > { %v988_v19 = vpop.permute.xlu1 %987 }
 0x245   : > { %v1142_v50 = vmul.f32 %v1479_v20, %v988_v19  ;;  %v1143_v22 = vmul.f32 %v1480_v21, %v988_v19  ;;  %v983_v23 = vpop.permute.xlu0 %982 }
 0x246   : > { %v1140_v25 = vmul.f32 %v1481_v24, %v983_v23  ;;  %v1141_v27 = vmul.f32 %v1482_v26, %v983_v23 }
 0x247   : > { %1206 = vst [vmem:[%s2058_s6 + $0x10] sm:$0xff] %v1142_v50  ;;  %1207 = vst [vmem:[%s2058_s6 + $0x18] sm:$0xff] %v1143_v22  ;;  %v1505_v50 = vld [vmem:[%s1598_s23 + $0xa0] sm:$0xff]  ;;  %v1506_v22 = vld [vmem:[%s1598_s23 + $0xa8] sm:$0xff] }
 0x248   : > { %1204 = vst [vmem:[%s2058_s6] sm:$0xff] %v1140_v25  ;;  %1205 = vst [vmem:[%s2058_s6 + $0x8] sm:$0xff] %v1141_v27  ;;  %v1507_v25 = vld [vmem:[%s1598_s23 + $0x110] sm:$0xff]  ;;  %v1508_v27 = vld [vmem:[%s1598_s23 + $0x118] sm:$0xff] }
 0x249   : > { %v993_v28 = vpop.permute.xlu1 %992 }
 0x24a   : > { %v1144_v30 = vmul.f32 %v1483_v29, %v993_v28  ;;  %v1145_v32 = vmul.f32 %v1484_v31, %v993_v28 }
 0x24c   : > { %1208 = vst [vmem:[%s2058_s6 + $0x20] sm:$0xff] %v1144_v30  ;;  %1209 = vst [vmem:[%s2058_s6 + $0x28] sm:$0xff] %v1145_v32  ;;  %v1509_v30 = vld [vmem:[%s1598_s23 + $0xc0] sm:$0xff]  ;;  %v1510_v32 = vld [vmem:[%s1598_s23 + $0xc8] sm:$0xff] }
 0x24d   : > { %v998_v33 = vpop.permute.xlu1 %997 }
 0x24e   : > { %v1146_v35 = vmul.f32 %v1485_v34, %v998_v33  ;;  %v1147_v37 = vmul.f32 %v1486_v36, %v998_v33 }
 0x250   : > { %1210 = vst [vmem:[%s2058_s6 + $0x30] sm:$0xff] %v1146_v35  ;;  %1211 = vst [vmem:[%s2058_s6 + $0x38] sm:$0xff] %v1147_v37  ;;  %v1511_v35 = vld [vmem:[%s1598_s23 + $0x130] sm:$0xff]  ;;  %v1512_v37 = vld [vmem:[%s1598_s23 + $0x138] sm:$0xff] }
 0x251   : > { %v1003_v38 = vpop.permute.xlu1 %1002 }
 0x252   : > { %v1148_v40 = vmul.f32 %v1487_v39, %v1003_v38  ;;  %v1149_v42 = vmul.f32 %v1488_v41, %v1003_v38 }
 0x254   : > { %1212 = vst [vmem:[%s2058_s6 + $0x40] sm:$0xff] %v1148_v40  ;;  %1213 = vst [vmem:[%s2058_s6 + $0x48] sm:$0xff] %v1149_v42  ;;  %v1028_v43 = vpop.permute.xlu0 %1027  ;;  %v1513_v40 = vld [vmem:[%s1598_s23 + $0xe0] sm:$0xff]  ;;  %v1514_v42 = vld [vmem:[%s1598_s23 + $0xe8] sm:$0xff] }
 0x255   : > { %v1008_v44 = vpop.permute.xlu1 %1007  ;;  %v1158_v46 = vmul.f32 %v1489_v45, %v1028_v43  ;;  %v1159_v48 = vmul.f32 %v1490_v47, %v1028_v43  ;;  %v1515_v45 = vld [vmem:[%s1598_s23 + $0x150] sm:$0xff]  ;;  %v1516_v47 = vld [vmem:[%s1598_s23 + $0x158] sm:$0xff] }
 0x256   : > { %v1150_v51 = vmul.f32 %v1491_v49, %v1008_v44  ;;  %v1151_v53 = vmul.f32 %v1492_v52, %v1008_v44 }
 0x257   : > { %1222 = vst [vmem:[%s2058_s6 + $0x90] sm:$0xff] %v1158_v46  ;;  %1223 = vst [vmem:[%s2058_s6 + $0x98] sm:$0xff] %v1159_v48 }
 0x258   : > { %1214 = vst [vmem:[%s2058_s6 + $0x50] sm:$0xff] %v1150_v51  ;;  %1215 = vst [vmem:[%s2058_s6 + $0x58] sm:$0xff] %v1151_v53  ;;  %v1038_v54 = vpop.permute.xlu0 %1037  ;;  %v1517_v51 = vld [vmem:[%s1598_s23 + $0x100] sm:$0xff]  ;;  %v1518_v53 = vld [vmem:[%s1598_s23 + $0x108] sm:$0xff] }
 0x259   : > { %v1013_v55 = vpop.permute.xlu1 %1012  ;;  %v1162_v57 = vmul.f32 %v1493_v56, %v1038_v54  ;;  %v1163_v59 = vmul.f32 %v1494_v58, %v1038_v54  ;;  %v1519_v56 = vld [vmem:[%s1598_s23 + $0x170] sm:$0xff]  ;;  %v1520_v58 = vld [vmem:[%s1598_s23 + $0x178] sm:$0xff] }
 0x25a   : > { %v1152_v61 = vmul.f32 %v1495_v60, %v1013_v55  ;;  %v1153_v63 = vmul.f32 %v1496_v62, %v1013_v55 }
 0x25b   : > { %1226 = vst [vmem:[%s2058_s6 + $0xb0] sm:$0xff] %v1162_v57  ;;  %1227 = vst [vmem:[%s2058_s6 + $0xb8] sm:$0xff] %v1163_v59 }
 0x25c   : > { %1216 = vst [vmem:[%s2058_s6 + $0x60] sm:$0xff] %v1152_v61  ;;  %1217 = vst [vmem:[%s2058_s6 + $0x68] sm:$0xff] %v1153_v63  ;;  %v1048_v0 = vpop.permute.xlu0 %1047  ;;  %v1521_v61 = vld [vmem:[%s1598_s23 + $0x120] sm:$0xff]  ;;  %v1522_v63 = vld [vmem:[%s1598_s23 + $0x128] sm:$0xff] }
 0x25d   : > { %v1018_v1 = vpop.permute.xlu1 %1017  ;;  %v1166_v3 = vmul.f32 %v1497_v2, %v1048_v0  ;;  %v1167_v5 = vmul.f32 %v1498_v4, %v1048_v0  ;;  %v1523_v2 = vld [vmem:[%s1598_s23 + $0x190] sm:$0xff]  ;;  %v1524_v4 = vld [vmem:[%s1598_s23 + $0x198] sm:$0xff] }
 0x25e   : > { %v1154_v7 = vmul.f32 %v1499_v6, %v1018_v1  ;;  %v1155_v9 = vmul.f32 %v1500_v8, %v1018_v1 }
 0x25f   : > { %1230 = vst [vmem:[%s2058_s6 + $0xd0] sm:$0xff] %v1166_v3  ;;  %1231 = vst [vmem:[%s2058_s6 + $0xd8] sm:$0xff] %v1167_v5 }
 0x260   : > { %1218 = vst [vmem:[%s2058_s6 + $0x70] sm:$0xff] %v1154_v7  ;;  %1219 = vst [vmem:[%s2058_s6 + $0x78] sm:$0xff] %v1155_v9  ;;  %v1525_v7 = vld [vmem:[%s1598_s23 + $0x140] sm:$0xff]  ;;  %v1526_v9 = vld [vmem:[%s1598_s23 + $0x148] sm:$0xff] }
 0x261   : > { %v1023_v10 = vpop.permute.xlu1 %1022 }
 0x262   : > { %v1156_v12 = vmul.f32 %v1501_v11, %v1023_v10  ;;  %v1157_v14 = vmul.f32 %v1502_v13, %v1023_v10  ;;  %v1058_v15 = vpop.permute.xlu0 %1057 }
 0x263   : > { %v1170_v17 = vmul.f32 %v1503_v16, %v1058_v15  ;;  %v1171_v19 = vmul.f32 %v1504_v18, %v1058_v15 }
 0x264   : > { %1220 = vst [vmem:[%s2058_s6 + $0x80] sm:$0xff] %v1156_v12  ;;  %1221 = vst [vmem:[%s2058_s6 + $0x88] sm:$0xff] %v1157_v14  ;;  %v1527_v12 = vld [vmem:[%s1598_s23 + $0x1b0] sm:$0xff]  ;;  %v1528_v14 = vld [vmem:[%s1598_s23 + $0x1b8] sm:$0xff] }
 0x265   : > { %1234 = vst [vmem:[%s2058_s6 + $0xf0] sm:$0xff] %v1170_v17  ;;  %1235 = vst [vmem:[%s2058_s6 + $0xf8] sm:$0xff] %v1171_v19  ;;  %v1033_v20 = vpop.permute.xlu1 %1032  ;;  %v1529_v17 = vld [vmem:[%s1598_s23 + $0x160] sm:$0xff]  ;;  %v1530_v19 = vld [vmem:[%s1598_s23 + $0x168] sm:$0xff] }
 0x266   : > { %v1160_v21 = vmul.f32 %v1505_v50, %v1033_v20  ;;  %v1161_v23 = vmul.f32 %v1506_v22, %v1033_v20  ;;  %v1068_v24 = vpop.permute.xlu0 %1067 }
 0x267   : > { %v1174_v26 = vmul.f32 %v1507_v25, %v1068_v24  ;;  %v1175_v28 = vmul.f32 %v1508_v27, %v1068_v24 }
 0x268   : > { %1224 = vst [vmem:[%s2058_s6 + $0xa0] sm:$0xff] %v1160_v21  ;;  %1225 = vst [vmem:[%s2058_s6 + $0xa8] sm:$0xff] %v1161_v23  ;;  %v1531_v21 = vld [vmem:[%s1598_s23 + $0x1d0] sm:$0xff]  ;;  %v1532_v23 = vld [vmem:[%s1598_s23 + $0x1d8] sm:$0xff] }
 0x269   : > { %1238 = vst [vmem:[%s2058_s6 + $0x110] sm:$0xff] %v1174_v26  ;;  %1239 = vst [vmem:[%s2058_s6 + $0x118] sm:$0xff] %v1175_v28  ;;  %v1043_v29 = vpop.permute.xlu1 %1042  ;;  %v1533_v26 = vld [vmem:[%s1598_s23 + $0x180] sm:$0xff]  ;;  %v1534_v28 = vld [vmem:[%s1598_s23 + $0x188] sm:$0xff] }
 0x26a   : > { %v1164_v31 = vmul.f32 %v1509_v30, %v1043_v29  ;;  %v1165_v33 = vmul.f32 %v1510_v32, %v1043_v29  ;;  %v1078_v34 = vpop.permute.xlu0 %1077 }
 0x26b   : > { %v1178_v36 = vmul.f32 %v1511_v35, %v1078_v34  ;;  %v1179_v38 = vmul.f32 %v1512_v37, %v1078_v34 }
 0x26c   : > { %1228 = vst [vmem:[%s2058_s6 + $0xc0] sm:$0xff] %v1164_v31  ;;  %1229 = vst [vmem:[%s2058_s6 + $0xc8] sm:$0xff] %v1165_v33  ;;  %v1535_v31 = vld [vmem:[%s1598_s23 + $0x1f0] sm:$0xff]  ;;  %v1536_v33 = vld [vmem:[%s1598_s23 + $0x1f8] sm:$0xff] }
 0x26d   : > { %1242 = vst [vmem:[%s2058_s6 + $0x130] sm:$0xff] %v1178_v36  ;;  %1243 = vst [vmem:[%s2058_s6 + $0x138] sm:$0xff] %v1179_v38  ;;  %v1053_v39 = vpop.permute.xlu1 %1052  ;;  %v1537_v36 = vld [vmem:[%s1598_s23 + $0x1a0] sm:$0xff]  ;;  %v1538_v38 = vld [vmem:[%s1598_s23 + $0x1a8] sm:$0xff] }
 0x26e   : > { %v1168_v41 = vmul.f32 %v1513_v40, %v1053_v39  ;;  %v1169_v43 = vmul.f32 %v1514_v42, %v1053_v39  ;;  %v1088_v44 = vpop.permute.xlu0 %1087 }
 0x26f   : > { %v1182_v46 = vmul.f32 %v1515_v45, %v1088_v44  ;;  %v1183_v48 = vmul.f32 %v1516_v47, %v1088_v44 }
 0x270   : > { %1232 = vst [vmem:[%s2058_s6 + $0xe0] sm:$0xff] %v1168_v41  ;;  %1233 = vst [vmem:[%s2058_s6 + $0xe8] sm:$0xff] %v1169_v43  ;;  %v1539_v41 = vld [vmem:[%s1598_s23 + $0x1c0] sm:$0xff]  ;;  %v1540_v43 = vld [vmem:[%s1598_s23 + $0x1c8] sm:$0xff] }
 0x271   : > { %1246 = vst [vmem:[%s2058_s6 + $0x150] sm:$0xff] %v1182_v46  ;;  %1247 = vst [vmem:[%s2058_s6 + $0x158] sm:$0xff] %v1183_v48  ;;  %v1063_v49 = vpop.permute.xlu1 %1062  ;;  %v1541_v46 = vld [vmem:[%s1598_s23 + $0x1e0] sm:$0xff]  ;;  %v1542_v48 = vld [vmem:[%s1598_s23 + $0x1e8] sm:$0xff] }
 0x272   : > { %v1172_v52 = vmul.f32 %v1517_v51, %v1063_v49  ;;  %v1173_v54 = vmul.f32 %v1518_v53, %v1063_v49  ;;  %v1098_v55 = vpop.permute.xlu0 %1097 }
 0x273   : > { %v1186_v57 = vmul.f32 %v1519_v56, %v1098_v55  ;;  %v1187_v59 = vmul.f32 %v1520_v58, %v1098_v55 }
 0x274   : > { %1236 = vst [vmem:[%s2058_s6 + $0x100] sm:$0xff] %v1172_v52  ;;  %1237 = vst [vmem:[%s2058_s6 + $0x108] sm:$0xff] %v1173_v54 }
 0x275   : > { %1250 = vst [vmem:[%s2058_s6 + $0x170] sm:$0xff] %v1186_v57  ;;  %1251 = vst [vmem:[%s2058_s6 + $0x178] sm:$0xff] %v1187_v59  ;;  %v1073_v60 = vpop.permute.xlu1 %1072 }
 0x276   : > { %v1176_v62 = vmul.f32 %v1521_v61, %v1073_v60  ;;  %v1177_v0 = vmul.f32 %v1522_v63, %v1073_v60  ;;  %v1108_v1 = vpop.permute.xlu0 %1107 }
 0x277   : > { %v1190_v3 = vmul.f32 %v1523_v2, %v1108_v1  ;;  %v1191_v5 = vmul.f32 %v1524_v4, %v1108_v1 }
 0x278   : > { %1240 = vst [vmem:[%s2058_s6 + $0x120] sm:$0xff] %v1176_v62  ;;  %1241 = vst [vmem:[%s2058_s6 + $0x128] sm:$0xff] %v1177_v0 }
 0x279   : > { %1254 = vst [vmem:[%s2058_s6 + $0x190] sm:$0xff] %v1190_v3  ;;  %1255 = vst [vmem:[%s2058_s6 + $0x198] sm:$0xff] %v1191_v5  ;;  %v1083_v6 = vpop.permute.xlu1 %1082 }
 0x27a   : > { %v1180_v8 = vmul.f32 %v1525_v7, %v1083_v6  ;;  %v1181_v10 = vmul.f32 %v1526_v9, %v1083_v6  ;;  %v1118_v11 = vpop.permute.xlu0 %1117 }
 0x27b   : > { %v1194_v13 = vmul.f32 %v1527_v12, %v1118_v11  ;;  %v1195_v15 = vmul.f32 %v1528_v14, %v1118_v11 }
 0x27c   : > { %1244 = vst [vmem:[%s2058_s6 + $0x140] sm:$0xff] %v1180_v8  ;;  %1245 = vst [vmem:[%s2058_s6 + $0x148] sm:$0xff] %v1181_v10 }
 0x27d   : > { %1258 = vst [vmem:[%s2058_s6 + $0x1b0] sm:$0xff] %v1194_v13  ;;  %1259 = vst [vmem:[%s2058_s6 + $0x1b8] sm:$0xff] %v1195_v15  ;;  %v1093_v16 = vpop.permute.xlu1 %1092 }
 0x27e   : > { %v1184_v18 = vmul.f32 %v1529_v17, %v1093_v16  ;;  %v1185_v20 = vmul.f32 %v1530_v19, %v1093_v16  ;;  %v1128_v50 = vpop.permute.xlu0 %1127 }
 0x27f   : > { %v1198_v22 = vmul.f32 %v1531_v21, %v1128_v50  ;;  %v1199_v24 = vmul.f32 %v1532_v23, %v1128_v50 }
 0x280   : > { %1248 = vst [vmem:[%s2058_s6 + $0x160] sm:$0xff] %v1184_v18  ;;  %1249 = vst [vmem:[%s2058_s6 + $0x168] sm:$0xff] %v1185_v20 }
 0x281   : > { %1262 = vst [vmem:[%s2058_s6 + $0x1d0] sm:$0xff] %v1198_v22  ;;  %1263 = vst [vmem:[%s2058_s6 + $0x1d8] sm:$0xff] %v1199_v24  ;;  %v1103_v25 = vpop.permute.xlu1 %1102 }
 0x282   : > { %v1188_v27 = vmul.f32 %v1533_v26, %v1103_v25  ;;  %v1189_v29 = vmul.f32 %v1534_v28, %v1103_v25  ;;  %v1138_v30 = vpop.permute.xlu0 %1137 }
 0x283   : > { %v1202_v32 = vmul.f32 %v1535_v31, %v1138_v30  ;;  %v1203_v34 = vmul.f32 %v1536_v33, %v1138_v30 }
 0x284   : > { %1252 = vst [vmem:[%s2058_s6 + $0x180] sm:$0xff] %v1188_v27  ;;  %1253 = vst [vmem:[%s2058_s6 + $0x188] sm:$0xff] %v1189_v29 }
 0x285   : > { %1266 = vst [vmem:[%s2058_s6 + $0x1f0] sm:$0xff] %v1202_v32  ;;  %1267 = vst [vmem:[%s2058_s6 + $0x1f8] sm:$0xff] %v1203_v34  ;;  %v1113_v35 = vpop.permute.xlu1 %1112 }
 0x286   : > { %v1192_v37 = vmul.f32 %v1537_v36, %v1113_v35  ;;  %v1193_v39 = vmul.f32 %v1538_v38, %v1113_v35 }
 0x288   : > { %1256 = vst [vmem:[%s2058_s6 + $0x1a0] sm:$0xff] %v1192_v37  ;;  %1257 = vst [vmem:[%s2058_s6 + $0x1a8] sm:$0xff] %v1193_v39 }
 0x289   : > { %v1123_v40 = vpop.permute.xlu1 %1122 }
 0x28a   : > { %v1196_v42 = vmul.f32 %v1539_v41, %v1123_v40  ;;  %v1197_v44 = vmul.f32 %v1540_v43, %v1123_v40 }
 0x28c   : > { %1260 = vst [vmem:[%s2058_s6 + $0x1c0] sm:$0xff] %v1196_v42  ;;  %1261 = vst [vmem:[%s2058_s6 + $0x1c8] sm:$0xff] %v1197_v44 }
 0x28d   : > { %v1133_v45 = vpop.permute.xlu1 %1132 }
 0x28e   : > { %v1200_v47 = vmul.f32 %v1541_v46, %v1133_v45  ;;  %v1201_v49 = vmul.f32 %v1542_v48, %v1133_v45 }
 0x290   : > { %1264 = vst [vmem:[%s2058_s6 + $0x1e0] sm:$0xff] %v1200_v47  ;;  %1265 = vst [vmem:[%s2058_s6 + $0x1e8] sm:$0xff] %v1201_v49 }
 0x291 PF: > { %s15_s18 = sadd.s32 1, %s1549_s18  }
 0x292   : > { %p12_p4 = scmp.ge.s32.totalorder %s15_s18, 4  }
 0x294   :  { %14 = sbr.rel (!%p12_p4) target bundleno = 1 (0x1), region = 70 }

</bundles_post_ra>
